<compile_context>
chip_gen: v5e
topology: v5e:2x2
jax: 0.10.0
libtpu: 0.0.40
codegen_flags: <defaults>
</compile_context>

<pallas_src>
import functools

import jax
import jax.numpy as jnp
from jax.experimental import pallas as pl
from jax.experimental.pallas import tpu as pltpu


def decoder_kernel(x0_ref, h0_ref, c0_ref,
                   w_ih_ref, w_hh_ref, b_g_ref, w_hp_ref, b_hp_ref,
                   pred_ref, hout_ref,
                   *, g_pad, decoder_len, residual, unroll):
    batch, emb = x0_ref.shape

    # Hoisted weight loads: live in vregs for the whole recurrence.
    w_ih = w_ih_ref[...]          # (emb,   4*g_pad)   gate-block-padded W_ih^T
    w_hh = w_hh_ref[...]          # (g_pad, 4*g_pad)   gate-block-padded W_hh^T (zero rows >= h_dim)
    w_hp = w_hp_ref[...]          # (g_pad, emb)       hidden2pose^T        (zero rows >= h_dim)
    w_dt = w_ih.dtype             # f32, or bf16 when use_bf16_mxu

    # Hoisted loop invariants (built ONCE, not per unrolled iteration):
    #  - lane mask selecting the g gate block (tanh lanes) of the padded gate tile,
    #  - per-lane scale/offset tiles implementing sigmoid via a single tanh pass,
    #  - biases pre-broadcast to full (batch, N) tiles.
    lane = jax.lax.broadcasted_iota(jnp.int32, (batch, 4 * g_pad), 1)
    is_g = (lane >= 2 * g_pad) & (lane < 3 * g_pad)
    one = jnp.float32(1.0)
    half = jnp.float32(0.5)
    zero = jnp.float32(0.0)
    gate_scale = jnp.where(is_g, one, half)    # pre- and post-scale
    gate_offset = jnp.where(is_g, zero, half)  # post-offset (sigmoid lanes only)
    b_g = jnp.broadcast_to(b_g_ref[...], (batch, 4 * g_pad))   # b_ih + b_hh, padded
    b_hp = jnp.broadcast_to(b_hp_ref[...], (batch, emb))

    def step(t, carry):
        x, h, c = carry           # (batch, emb), (batch, g_pad), (batch, g_pad)

        # Two MXU pushes (no per-step lane concat) + pre-added bias.
        gates = (jnp.dot(x.astype(w_dt), w_ih, preferred_element_type=jnp.float32)
                 + jnp.dot(h.astype(w_dt), w_hh, preferred_element_type=jnp.float32)
                 + b_g)                                        # (batch, 4*g_pad)

        # Single full-tile EUP tanh pass:
        #   g lanes:        tanh(x)
        #   i/f/o lanes:    sigmoid(x) = 0.5 * tanh(0.5*x) + 0.5
        act = jnp.tanh(gates * gate_scale) * gate_scale + gate_offset

        # Lane-aligned whole-block gate slices (gate order [i, f, g, o]).
        i_g = act[:, 0 * g_pad:1 * g_pad]
        f_g = act[:, 1 * g_pad:2 * g_pad]
        g_g = act[:, 2 * g_pad:3 * g_pad]
        o_g = act[:, 3 * g_pad:4 * g_pad]

        # Padded lanes stay exactly zero across steps (zero gate pre-activations,
        # zero-initialized c padding, zero weight rows), so they never perturb
        # the real lanes.
        c_new = f_g * c + i_g * g_g
        h_new = o_g * jnp.tanh(c_new)

        # hidden2pose: Linear(h_dim -> Inp_size) (+ residual skip).
        pose = jnp.dot(h_new.astype(w_dt), w_hp,
                       preferred_element_type=jnp.float32) + b_hp   # (batch, emb)
        if residual:
            pose = pose + x

        pred_ref[t] = pose          # row t of the resident pred block (VMEM store)
        return pose, h_new, c_new

    x, h, c = jax.lax.fori_loop(
        0, decoder_len, step,
        (x0_ref[...], h0_ref[...], c0_ref[...]),
        unroll=unroll)

    # Final hidden state: lane-dense (g_pad lanes), stored exactly once.
    hout_ref[...] = h


def _pad_gate_cols(w_t, h_dim, g_pad):
    """(K, 4*h_dim) -> (K, 4*g_pad): each gate block padded to g_pad lanes with zeros."""
    k_dim = w_t.shape[0]
    w = w_t.reshape(k_dim, 4, h_dim)
    w = jnp.pad(w, ((0, 0), (0, 0), (0, g_pad - h_dim)))
    return w.reshape(k_dim, 4 * g_pad)


def decoder_curriculum_forward(last_pos, h0, c0, params, decoder_len,
                               residual=True, use_bf16_mxu=False):
    """last_pos: (batch, joints); h0, c0: (1, batch, h_dim).  joints == embedding_dim."""
    batch, emb = last_pos.shape
    h_dim = h0.shape[-1]
    g_pad = ((h_dim + 127) // 128) * 128      # per-gate 128-lane alignment

    # Host-side weight prep: pre-add gate biases, transpose, and pad every gate
    # block to g_pad lanes; zero-pad the hidden-contraction rows to g_pad so the
    # carried state can stay lane-padded with no effect on the result.
    w_ih_g = _pad_gate_cols(params["w_ih"].T, h_dim, g_pad)                 # (emb,   4*g_pad)
    w_hh_g = _pad_gate_cols(params["w_hh"].T, h_dim, g_pad)                 # (h_dim, 4*g_pad)
    w_hh_g = jnp.pad(w_hh_g, ((0, g_pad - h_dim), (0, 0)))                  # (g_pad, 4*g_pad)
    b_g = _pad_gate_cols((params["b_ih"] + params["b_hh"]).reshape(1, -1),
                         h_dim, g_pad)                                      # (1, 4*g_pad)
    w_hp_g = jnp.pad(params["w_hp"].T, ((0, g_pad - h_dim), (0, 0)))        # (g_pad, emb)
    b_hp = params["b_hp"].reshape(1, emb)

    if use_bf16_mxu:
        # v6e/v7x: bf16 MXU inputs cut per-push pass count; accumulate in f32.
        w_ih_g = w_ih_g.astype(jnp.bfloat16)
        w_hh_g = w_hh_g.astype(jnp.bfloat16)
        w_hp_g = w_hp_g.astype(jnp.bfloat16)

    # Pad the carried state to g_pad lanes (padded lanes start at zero and stay zero).
    h0_p = jnp.pad(h0[0], ((0, 0), (0, g_pad - h_dim)))
    c0_p = jnp.pad(c0[0], ((0, 0), (0, g_pad - h_dim)))

    # Full unroll for short horizons; partial unroll for long ones (code-size /
    # vreg-pressure bound) while keeping LLO scheduling visibility.
    unroll = decoder_len if decoder_len <= 16 else 8

    kernel = functools.partial(decoder_kernel, g_pad=g_pad,
                               decoder_len=decoder_len, residual=residual,
                               unroll=unroll)

    # Single invocation (no grid): all operands, state, and outputs stay resident in
    # VMEM (<20 KiB total at these shapes, far under 64/128 MiB) for the whole
    # recurrence; one HBM writeback per output at the end.
    # (If production batch grows to >=128, add a leading batch-tile "parallel" grid
    #  axis to shard across v7x's two TensorCores / fill more MXU rows per push.)
    pred, h_out = pl.pallas_call(
        kernel,
        out_shape=(
            jax.ShapeDtypeStruct((decoder_len, batch, emb), jnp.float32),
            jax.ShapeDtypeStruct((batch, g_pad), jnp.float32),
        ),
    )(last_pos, h0_p, c0_p, w_ih_g, w_hh_g, b_g, w_hp_g, b_hp)

    return pred, h_out[:, :h_dim][None]


def reference_forward(last_pos, h0, c0, params, decoder_len, residual=True):
    """Pure-JAX reference matching the PyTorch forward (pool_every_timestep=False)."""
    h_dim = h0.shape[-1]
    x = last_pos
    h = h0[0]
    c = c0[0]
    preds = []
    for _ in range(decoder_len):
        gates = (x @ params["w_ih"].T + params["b_ih"]
                 + h @ params["w_hh"].T + params["b_hh"])
        i_g = jax.nn.sigmoid(gates[:, 0 * h_dim:1 * h_dim])
        f_g = jax.nn.sigmoid(gates[:, 1 * h_dim:2 * h_dim])
        g_g = jnp.tanh(gates[:, 2 * h_dim:3 * h_dim])
        o_g = jax.nn.sigmoid(gates[:, 3 * h_dim:4 * h_dim])
        c = f_g * c + i_g * g_g
        h = o_g * jnp.tanh(c)
        pose = h @ params["w_hp"].T + params["b_hp"]
        if residual:
            pose = pose + x
        x = pose
        preds.append(pose)
    return jnp.stack(preds, axis=0), h[None]


if __name__ == "__main__":
    # Small shapes consistent with the module: joints == Inp_size == embedding_dim.
    batch = 8
    embedding_dim = 16     # == joints == Inp_size
    h_dim = 32
    decoder_len = 5

    key = jax.random.PRNGKey(0)
    ks = jax.random.split(key, 10)

    params = {
        "w_ih": 0.1 * jax.random.normal(ks[0], (4 * h_dim, embedding_dim), jnp.float32),
        "w_hh": 0.1 * jax.random.normal(ks[1], (4 * h_dim, h_dim), jnp.float32),
        "b_ih": 0.1 * jax.random.normal(ks[2], (4 * h_dim,), jnp.float32),
        "b_hh": 0.1 * jax.random.normal(ks[3], (4 * h_dim,), jnp.float32),
        "w_hp": 0.1 * jax.random.normal(ks[4], (embedding_dim, h_dim), jnp.float32),
        "b_hp": 0.1 * jax.random.normal(ks[5], (embedding_dim,), jnp.float32),
    }

    last_pos = jax.random.normal(ks[6], (batch, embedding_dim), jnp.float32)
    h0 = jax.random.normal(ks[7], (1, batch, h_dim), jnp.float32)
    c0 = jax.random.normal(ks[8], (1, batch, h_dim), jnp.float32)

    pred_pose, h_final = decoder_curriculum_forward(
        last_pos, h0, c0, params, decoder_len, residual=True, use_bf16_mxu=False)
    jax.block_until_ready((pred_pose, h_final))

    ref_pred, ref_h = reference_forward(last_pos, h0, c0, params, decoder_len, residual=True)

    assert pred_pose.shape == (decoder_len, batch, embedding_dim)
    assert h_final.shape == (1, batch, h_dim)
    assert jnp.allclose(pred_pose, ref_pred, atol=1e-4, rtol=1e-4)
    assert jnp.allclose(h_final, ref_h, atol=1e-4, rtol=1e-4)

    print("KERNEL_OK")
</pallas_src>

<mosaic_0001>
module attributes {stable_mosaic.version = 11 : i64} {
  func.func @decoder_kernel(%arg0: memref<8x16xf32, #tpu.memory_space<vmem>>, %arg1: memref<8x128xf32, #tpu.memory_space<vmem>>, %arg2: memref<8x128xf32, #tpu.memory_space<vmem>>, %arg3: memref<16x512xf32, #tpu.memory_space<vmem>>, %arg4: memref<128x512xf32, #tpu.memory_space<vmem>>, %arg5: memref<1x512xf32, #tpu.memory_space<vmem>>, %arg6: memref<128x16xf32, #tpu.memory_space<vmem>>, %arg7: memref<1x16xf32, #tpu.memory_space<vmem>>, %arg8: memref<5x8x16xf32, #tpu.memory_space<vmem>>, %arg9: memref<8x128xf32, #tpu.memory_space<vmem>>) attributes {dimension_semantics = [], scalar_prefetch = 0 : i64, scratch_operands = 0 : i64, tpu.core_type = #tpu.core_type<tc>} {
    %c0 = arith.constant 0 : index
    %c0_0 = arith.constant 0 : index
    %0 = vector.load %arg3[%c0, %c0_0] : memref<16x512xf32, #tpu.memory_space<vmem>>, vector<16x512xf32>
    %c0_1 = arith.constant 0 : index
    %c0_2 = arith.constant 0 : index
    %1 = vector.load %arg4[%c0_1, %c0_2] : memref<128x512xf32, #tpu.memory_space<vmem>>, vector<128x512xf32>
    %c0_3 = arith.constant 0 : index
    %c0_4 = arith.constant 0 : index
    %2 = vector.load %arg6[%c0_3, %c0_4] : memref<128x16xf32, #tpu.memory_space<vmem>>, vector<128x16xf32>
    %3 = tpu.iota {dimensions = array<i32: 1>} : vector<8x512xi32>
    %c256_i32 = arith.constant 256 : i32
    %4 = vector.broadcast %c256_i32 : i32 to vector<8x512xi32>
    %5 = arith.cmpi sge, %3, %4 : vector<8x512xi32>
    %c384_i32 = arith.constant 384 : i32
    %6 = vector.broadcast %c384_i32 : i32 to vector<8x512xi32>
    %7 = arith.cmpi slt, %3, %6 : vector<8x512xi32>
    %8 = arith.andi %5, %7 : vector<8x512xi1>
    %cst = arith.constant 1.000000e+00 : f32
    %cst_5 = arith.constant 5.000000e-01 : f32
    %9 = vector.broadcast %cst : f32 to vector<8x512xf32>
    %10 = vector.broadcast %cst_5 : f32 to vector<8x512xf32>
    %11 = arith.select %8, %9, %10 : vector<8x512xi1>, vector<8x512xf32>
    %cst_6 = arith.constant 0.000000e+00 : f32
    %cst_7 = arith.constant 5.000000e-01 : f32
    %12 = vector.broadcast %cst_6 : f32 to vector<8x512xf32>
    %13 = vector.broadcast %cst_7 : f32 to vector<8x512xf32>
    %14 = arith.select %8, %12, %13 : vector<8x512xi1>, vector<8x512xf32>
    %c0_8 = arith.constant 0 : index
    %c0_9 = arith.constant 0 : index
    %15 = vector.load %arg5[%c0_8, %c0_9] : memref<1x512xf32, #tpu.memory_space<vmem>>, vector<1x512xf32>
    %16 = vector.shape_cast %15 : vector<1x512xf32> to vector<1x512xf32>
    %17 = vector.broadcast %16 : vector<1x512xf32> to vector<8x512xf32>
    %c0_10 = arith.constant 0 : index
    %c0_11 = arith.constant 0 : index
    %18 = vector.load %arg7[%c0_10, %c0_11] : memref<1x16xf32, #tpu.memory_space<vmem>>, vector<1x16xf32>
    %19 = vector.shape_cast %18 : vector<1x16xf32> to vector<1x16xf32>
    %20 = vector.broadcast %19 : vector<1x16xf32> to vector<8x16xf32>
    %c0_12 = arith.constant 0 : index
    %c0_13 = arith.constant 0 : index
    %21 = vector.load %arg0[%c0_12, %c0_13] : memref<8x16xf32, #tpu.memory_space<vmem>>, vector<8x16xf32>
    %c0_14 = arith.constant 0 : index
    %c0_15 = arith.constant 0 : index
    %22 = vector.load %arg1[%c0_14, %c0_15] : memref<8x128xf32, #tpu.memory_space<vmem>>, vector<8x128xf32>
    %c0_16 = arith.constant 0 : index
    %c0_17 = arith.constant 0 : index
    %23 = vector.load %arg2[%c0_16, %c0_17] : memref<8x128xf32, #tpu.memory_space<vmem>>, vector<8x128xf32>
    %c0_i32 = arith.constant 0 : i32
    %cst_18 = arith.constant dense<0.000000e+00> : vector<8x512xf32>
    %24 = tpu.matmul %21, %0, %cst_18 {dimension_numbers = #tpu.dot_dimension_numbers<[1], [0], [0], [1], [0, 0, 1, 1], [], []>} : vector<8x16xf32>, vector<16x512xf32>, vector<8x512xf32> -> vector<8x512xf32>
    %cst_19 = arith.constant dense<0.000000e+00> : vector<8x512xf32>
    %25 = tpu.matmul %22, %1, %cst_19 {dimension_numbers = #tpu.dot_dimension_numbers<[1], [0], [0], [1], [0, 0, 1, 1], [], []>} : vector<8x128xf32>, vector<128x512xf32>, vector<8x512xf32> -> vector<8x512xf32>
    %26 = arith.addf %24, %25 : vector<8x512xf32>
    %27 = arith.addf %26, %17 : vector<8x512xf32>
    %28 = arith.mulf %27, %11 : vector<8x512xf32>
    %29 = math.tanh %28 : vector<8x512xf32>
    %30 = arith.mulf %29, %11 : vector<8x512xf32>
    %31 = arith.addf %30, %14 : vector<8x512xf32>
    %32 = vector.extract_strided_slice %31 {offsets = [0, 0], sizes = [8, 128], strides = [1, 1]} : vector<8x512xf32> to vector<8x128xf32>
    %33 = vector.extract_strided_slice %31 {offsets = [0, 128], sizes = [8, 128], strides = [1, 1]} : vector<8x512xf32> to vector<8x128xf32>
    %34 = vector.extract_strided_slice %31 {offsets = [0, 256], sizes = [8, 128], strides = [1, 1]} : vector<8x512xf32> to vector<8x128xf32>
    %35 = vector.extract_strided_slice %31 {offsets = [0, 384], sizes = [8, 128], strides = [1, 1]} : vector<8x512xf32> to vector<8x128xf32>
    %36 = arith.mulf %33, %23 : vector<8x128xf32>
    %37 = arith.mulf %32, %34 : vector<8x128xf32>
    %38 = arith.addf %36, %37 : vector<8x128xf32>
    %39 = math.tanh %38 : vector<8x128xf32>
    %40 = arith.mulf %35, %39 : vector<8x128xf32>
    %cst_20 = arith.constant dense<0.000000e+00> : vector<8x16xf32>
    %41 = tpu.matmul %40, %2, %cst_20 {dimension_numbers = #tpu.dot_dimension_numbers<[1], [0], [0], [1], [0, 0, 1, 1], [], []>} : vector<8x128xf32>, vector<128x16xf32>, vector<8x16xf32> -> vector<8x16xf32>
    %42 = arith.addf %41, %20 : vector<8x16xf32>
    %43 = arith.addf %42, %21 : vector<8x16xf32>
    %44 = arith.index_cast %c0_i32 : i32 to index
    %c0_21 = arith.constant 0 : index
    %c0_22 = arith.constant 0 : index
    %45 = vector.load %arg8[%44, %c0_21, %c0_22] : memref<5x8x16xf32, #tpu.memory_space<vmem>>, vector<1x8x16xf32>
    %46 = vector.shape_cast %45 : vector<1x8x16xf32> to vector<8x16xf32>
    %47 = vector.shape_cast %43 : vector<8x16xf32> to vector<1x8x16xf32>
    tpu.vector_store %arg8[%44, %c0_21, %c0_22], %47 {strides = array<i32>} : memref<5x8x16xf32, #tpu.memory_space<vmem>>, vector<1x8x16xf32>,
    %c1_i32 = arith.constant 1 : i32
    %cst_23 = arith.constant dense<0.000000e+00> : vector<8x512xf32>
    %48 = tpu.matmul %43, %0, %cst_23 {dimension_numbers = #tpu.dot_dimension_numbers<[1], [0], [0], [1], [0, 0, 1, 1], [], []>} : vector<8x16xf32>, vector<16x512xf32>, vector<8x512xf32> -> vector<8x512xf32>
    %cst_24 = arith.constant dense<0.000000e+00> : vector<8x512xf32>
    %49 = tpu.matmul %40, %1, %cst_24 {dimension_numbers = #tpu.dot_dimension_numbers<[1], [0], [0], [1], [0, 0, 1, 1], [], []>} : vector<8x128xf32>, vector<128x512xf32>, vector<8x512xf32> -> vector<8x512xf32>
    %50 = arith.addf %48, %49 : vector<8x512xf32>
    %51 = arith.addf %50, %17 : vector<8x512xf32>
    %52 = arith.mulf %51, %11 : vector<8x512xf32>
    %53 = math.tanh %52 : vector<8x512xf32>
    %54 = arith.mulf %53, %11 : vector<8x512xf32>
    %55 = arith.addf %54, %14 : vector<8x512xf32>
    %56 = vector.extract_strided_slice %55 {offsets = [0, 0], sizes = [8, 128], strides = [1, 1]} : vector<8x512xf32> to vector<8x128xf32>
    %57 = vector.extract_strided_slice %55 {offsets = [0, 128], sizes = [8, 128], strides = [1, 1]} : vector<8x512xf32> to vector<8x128xf32>
    %58 = vector.extract_strided_slice %55 {offsets = [0, 256], sizes = [8, 128], strides = [1, 1]} : vector<8x512xf32> to vector<8x128xf32>
    %59 = vector.extract_strided_slice %55 {offsets = [0, 384], sizes = [8, 128], strides = [1, 1]} : vector<8x512xf32> to vector<8x128xf32>
    %60 = arith.mulf %57, %38 : vector<8x128xf32>
    %61 = arith.mulf %56, %58 : vector<8x128xf32>
    %62 = arith.addf %60, %61 : vector<8x128xf32>
    %63 = math.tanh %62 : vector<8x128xf32>
    %64 = arith.mulf %59, %63 : vector<8x128xf32>
    %cst_25 = arith.constant dense<0.000000e+00> : vector<8x16xf32>
    %65 = tpu.matmul %64, %2, %cst_25 {dimension_numbers = #tpu.dot_dimension_numbers<[1], [0], [0], [1], [0, 0, 1, 1], [], []>} : vector<8x128xf32>, vector<128x16xf32>, vector<8x16xf32> -> vector<8x16xf32>
    %66 = arith.addf %65, %20 : vector<8x16xf32>
    %67 = arith.addf %66, %43 : vector<8x16xf32>
    %68 = arith.index_cast %c1_i32 : i32 to index
    %c0_26 = arith.constant 0 : index
    %c0_27 = arith.constant 0 : index
    %69 = vector.load %arg8[%68, %c0_26, %c0_27] : memref<5x8x16xf32, #tpu.memory_space<vmem>>, vector<1x8x16xf32>
    %70 = vector.shape_cast %69 : vector<1x8x16xf32> to vector<8x16xf32>
    %71 = vector.shape_cast %67 : vector<8x16xf32> to vector<1x8x16xf32>
    tpu.vector_store %arg8[%68, %c0_26, %c0_27], %71 {strides = array<i32>} : memref<5x8x16xf32, #tpu.memory_space<vmem>>, vector<1x8x16xf32>,
    %c2_i32 = arith.constant 2 : i32
    %cst_28 = arith.constant dense<0.000000e+00> : vector<8x512xf32>
    %72 = tpu.matmul %67, %0, %cst_28 {dimension_numbers = #tpu.dot_dimension_numbers<[1], [0], [0], [1], [0, 0, 1, 1], [], []>} : vector<8x16xf32>, vector<16x512xf32>, vector<8x512xf32> -> vector<8x512xf32>
    %cst_29 = arith.constant dense<0.000000e+00> : vector<8x512xf32>
    %73 = tpu.matmul %64, %1, %cst_29 {dimension_numbers = #tpu.dot_dimension_numbers<[1], [0], [0], [1], [0, 0, 1, 1], [], []>} : vector<8x128xf32>, vector<128x512xf32>, vector<8x512xf32> -> vector<8x512xf32>
    %74 = arith.addf %72, %73 : vector<8x512xf32>
    %75 = arith.addf %74, %17 : vector<8x512xf32>
    %76 = arith.mulf %75, %11 : vector<8x512xf32>
    %77 = math.tanh %76 : vector<8x512xf32>
    %78 = arith.mulf %77, %11 : vector<8x512xf32>
    %79 = arith.addf %78, %14 : vector<8x512xf32>
    %80 = vector.extract_strided_slice %79 {offsets = [0, 0], sizes = [8, 128], strides = [1, 1]} : vector<8x512xf32> to vector<8x128xf32>
    %81 = vector.extract_strided_slice %79 {offsets = [0, 128], sizes = [8, 128], strides = [1, 1]} : vector<8x512xf32> to vector<8x128xf32>
    %82 = vector.extract_strided_slice %79 {offsets = [0, 256], sizes = [8, 128], strides = [1, 1]} : vector<8x512xf32> to vector<8x128xf32>
    %83 = vector.extract_strided_slice %79 {offsets = [0, 384], sizes = [8, 128], strides = [1, 1]} : vector<8x512xf32> to vector<8x128xf32>
    %84 = arith.mulf %81, %62 : vector<8x128xf32>
    %85 = arith.mulf %80, %82 : vector<8x128xf32>
    %86 = arith.addf %84, %85 : vector<8x128xf32>
    %87 = math.tanh %86 : vector<8x128xf32>
    %88 = arith.mulf %83, %87 : vector<8x128xf32>
    %cst_30 = arith.constant dense<0.000000e+00> : vector<8x16xf32>
    %89 = tpu.matmul %88, %2, %cst_30 {dimension_numbers = #tpu.dot_dimension_numbers<[1], [0], [0], [1], [0, 0, 1, 1], [], []>} : vector<8x128xf32>, vector<128x16xf32>, vector<8x16xf32> -> vector<8x16xf32>
    %90 = arith.addf %89, %20 : vector<8x16xf32>
    %91 = arith.addf %90, %67 : vector<8x16xf32>
    %92 = arith.index_cast %c2_i32 : i32 to index
    %c0_31 = arith.constant 0 : index
    %c0_32 = arith.constant 0 : index
    %93 = vector.load %arg8[%92, %c0_31, %c0_32] : memref<5x8x16xf32, #tpu.memory_space<vmem>>, vector<1x8x16xf32>
    %94 = vector.shape_cast %93 : vector<1x8x16xf32> to vector<8x16xf32>
    %95 = vector.shape_cast %91 : vector<8x16xf32> to vector<1x8x16xf32>
    tpu.vector_store %arg8[%92, %c0_31, %c0_32], %95 {strides = array<i32>} : memref<5x8x16xf32, #tpu.memory_space<vmem>>, vector<1x8x16xf32>,
    %c3_i32 = arith.constant 3 : i32
    %cst_33 = arith.constant dense<0.000000e+00> : vector<8x512xf32>
    %96 = tpu.matmul %91, %0, %cst_33 {dimension_numbers = #tpu.dot_dimension_numbers<[1], [0], [0], [1], [0, 0, 1, 1], [], []>} : vector<8x16xf32>, vector<16x512xf32>, vector<8x512xf32> -> vector<8x512xf32>
    %cst_34 = arith.constant dense<0.000000e+00> : vector<8x512xf32>
    %97 = tpu.matmul %88, %1, %cst_34 {dimension_numbers = #tpu.dot_dimension_numbers<[1], [0], [0], [1], [0, 0, 1, 1], [], []>} : vector<8x128xf32>, vector<128x512xf32>, vector<8x512xf32> -> vector<8x512xf32>
    %98 = arith.addf %96, %97 : vector<8x512xf32>
    %99 = arith.addf %98, %17 : vector<8x512xf32>
    %100 = arith.mulf %99, %11 : vector<8x512xf32>
    %101 = math.tanh %100 : vector<8x512xf32>
    %102 = arith.mulf %101, %11 : vector<8x512xf32>
    %103 = arith.addf %102, %14 : vector<8x512xf32>
    %104 = vector.extract_strided_slice %103 {offsets = [0, 0], sizes = [8, 128], strides = [1, 1]} : vector<8x512xf32> to vector<8x128xf32>
    %105 = vector.extract_strided_slice %103 {offsets = [0, 128], sizes = [8, 128], strides = [1, 1]} : vector<8x512xf32> to vector<8x128xf32>
    %106 = vector.extract_strided_slice %103 {offsets = [0, 256], sizes = [8, 128], strides = [1, 1]} : vector<8x512xf32> to vector<8x128xf32>
    %107 = vector.extract_strided_slice %103 {offsets = [0, 384], sizes = [8, 128], strides = [1, 1]} : vector<8x512xf32> to vector<8x128xf32>
    %108 = arith.mulf %105, %86 : vector<8x128xf32>
    %109 = arith.mulf %104, %106 : vector<8x128xf32>
    %110 = arith.addf %108, %109 : vector<8x128xf32>
    %111 = math.tanh %110 : vector<8x128xf32>
    %112 = arith.mulf %107, %111 : vector<8x128xf32>
    %cst_35 = arith.constant dense<0.000000e+00> : vector<8x16xf32>
    %113 = tpu.matmul %112, %2, %cst_35 {dimension_numbers = #tpu.dot_dimension_numbers<[1], [0], [0], [1], [0, 0, 1, 1], [], []>} : vector<8x128xf32>, vector<128x16xf32>, vector<8x16xf32> -> vector<8x16xf32>
    %114 = arith.addf %113, %20 : vector<8x16xf32>
    %115 = arith.addf %114, %91 : vector<8x16xf32>
    %116 = arith.index_cast %c3_i32 : i32 to index
    %c0_36 = arith.constant 0 : index
    %c0_37 = arith.constant 0 : index
    %117 = vector.load %arg8[%116, %c0_36, %c0_37] : memref<5x8x16xf32, #tpu.memory_space<vmem>>, vector<1x8x16xf32>
    %118 = vector.shape_cast %117 : vector<1x8x16xf32> to vector<8x16xf32>
    %119 = vector.shape_cast %115 : vector<8x16xf32> to vector<1x8x16xf32>
    tpu.vector_store %arg8[%116, %c0_36, %c0_37], %119 {strides = array<i32>} : memref<5x8x16xf32, #tpu.memory_space<vmem>>, vector<1x8x16xf32>,
    %c4_i32 = arith.constant 4 : i32
    %cst_38 = arith.constant dense<0.000000e+00> : vector<8x512xf32>
    %120 = tpu.matmul %115, %0, %cst_38 {dimension_numbers = #tpu.dot_dimension_numbers<[1], [0], [0], [1], [0, 0, 1, 1], [], []>} : vector<8x16xf32>, vector<16x512xf32>, vector<8x512xf32> -> vector<8x512xf32>
    %cst_39 = arith.constant dense<0.000000e+00> : vector<8x512xf32>
    %121 = tpu.matmul %112, %1, %cst_39 {dimension_numbers = #tpu.dot_dimension_numbers<[1], [0], [0], [1], [0, 0, 1, 1], [], []>} : vector<8x128xf32>, vector<128x512xf32>, vector<8x512xf32> -> vector<8x512xf32>
    %122 = arith.addf %120, %121 : vector<8x512xf32>
    %123 = arith.addf %122, %17 : vector<8x512xf32>
    %124 = arith.mulf %123, %11 : vector<8x512xf32>
    %125 = math.tanh %124 : vector<8x512xf32>
    %126 = arith.mulf %125, %11 : vector<8x512xf32>
    %127 = arith.addf %126, %14 : vector<8x512xf32>
    %128 = vector.extract_strided_slice %127 {offsets = [0, 0], sizes = [8, 128], strides = [1, 1]} : vector<8x512xf32> to vector<8x128xf32>
    %129 = vector.extract_strided_slice %127 {offsets = [0, 128], sizes = [8, 128], strides = [1, 1]} : vector<8x512xf32> to vector<8x128xf32>
    %130 = vector.extract_strided_slice %127 {offsets = [0, 256], sizes = [8, 128], strides = [1, 1]} : vector<8x512xf32> to vector<8x128xf32>
    %131 = vector.extract_strided_slice %127 {offsets = [0, 384], sizes = [8, 128], strides = [1, 1]} : vector<8x512xf32> to vector<8x128xf32>
    %132 = arith.mulf %129, %110 : vector<8x128xf32>
    %133 = arith.mulf %128, %130 : vector<8x128xf32>
    %134 = arith.addf %132, %133 : vector<8x128xf32>
    %135 = math.tanh %134 : vector<8x128xf32>
    %136 = arith.mulf %131, %135 : vector<8x128xf32>
    %cst_40 = arith.constant dense<0.000000e+00> : vector<8x16xf32>
    %137 = tpu.matmul %136, %2, %cst_40 {dimension_numbers = #tpu.dot_dimension_numbers<[1], [0], [0], [1], [0, 0, 1, 1], [], []>} : vector<8x128xf32>, vector<128x16xf32>, vector<8x16xf32> -> vector<8x16xf32>
    %138 = arith.addf %137, %20 : vector<8x16xf32>
    %139 = arith.addf %138, %115 : vector<8x16xf32>
    %140 = arith.index_cast %c4_i32 : i32 to index
    %c0_41 = arith.constant 0 : index
    %c0_42 = arith.constant 0 : index
    %141 = vector.load %arg8[%140, %c0_41, %c0_42] : memref<5x8x16xf32, #tpu.memory_space<vmem>>, vector<1x8x16xf32>
    %142 = vector.shape_cast %141 : vector<1x8x16xf32> to vector<8x16xf32>
    %143 = vector.shape_cast %139 : vector<8x16xf32> to vector<1x8x16xf32>
    tpu.vector_store %arg8[%140, %c0_41, %c0_42], %143 {strides = array<i32>} : memref<5x8x16xf32, #tpu.memory_space<vmem>>, vector<1x8x16xf32>,
    %c5_i32 = arith.constant 5 : i32
    %c0_43 = arith.constant 0 : index
    %c0_44 = arith.constant 0 : index
    %144 = vector.load %arg9[%c0_43, %c0_44] : memref<8x128xf32, #tpu.memory_space<vmem>>, vector<8x128xf32>
    tpu.vector_store %arg9[%c0_43, %c0_44], %136 {strides = array<i32>} : memref<8x128xf32, #tpu.memory_space<vmem>>, vector<8x128xf32>,
    return
  }
}

</mosaic_0001>

<bundles_post_ra>
// kernel: tpu_custom_call.1
= control target key start
LH: loop header
LB: loop body
LE: loop exit
PB: predicated region body
PF: predicated region fallthrough
CT: control target
= control target key end

     0   :  { %15 = vsyncpa [#allocation3], 0  ;;  %s2328_s0 = inlined_call_operand.vmem [shape: f32[8,16], index: 0, kind: input, shape index: {}]   ;;  %s2329_s1 = inlined_call_operand.vmem [shape: f32[8,128], index: 1, kind: input, shape index: {}]   ;;  %s2330_s2 = inlined_call_operand.vmem [shape: f32[8,128], index: 2, kind: input, shape index: {}]   ;;  %s2331_s3 = inlined_call_operand.vmem [shape: f32[16,512], index: 3, kind: input, shape index: {}]   ;;  %s2332_s4 = inlined_call_operand.hbm [shape: f32[128,512], index: 4, kind: input, shape index: {}]   ;;  %s2333_s5 = inlined_call_operand.vmem [shape: f32[1,512], index: 5, kind: input, shape index: {}]   ;;  %s2334_s6 = inlined_call_operand.vmem [shape: f32[128,16], index: 6, kind: input, shape index: {}]   ;;  %s2335_s7 = inlined_call_operand.vmem [shape: f32[1,16], index: 7, kind: input, shape index: {}]   ;;  %s2336_s8 = inlined_call_operand.hbm [shape: f32[5,8,16], index: 8, kind: output, shape index: {0}]   ;;  %s2337_s9 = inlined_call_operand.hbm [shape: f32[8,128], index: 9, kind: output, shape index: {1}]  }
   0x1   :  { %16 = vsyncpa [#allocation4], 0 }
   0x2   :  { %17 = vsyncpa [#allocation7], 0  ;;  %s30_s11 = sshll.u32 %s2332_s4, 4  ;;  %s1494_s12 = smov [#allocation2]   ;;  %s31_s11 = int_to_ptr.hbm [resolvable:$true] %s30_s11 }
   0x3   :  { %s32_s13 = sshll.u32 %s1494_s12, 4  ;;  %s1495_s14 = smov 512   ;;  %s33_s13 = int_to_ptr.vmem [resolvable:$true] %s32_s13 }
   0x4   :  { %s1496_s15 = smov 32  }
   0x5   :  { %38 = dma.hbm_to_vmem [thread:$0]  %s31_s11, 8192, %s33_s13, [#allocation3], %s1495_s14, %s1495_s14, %s1496_s15  }
   0x6   :  { %1488 = dma.done.wait [#allocation3], 8192  }
   0x7   :  { %1489 = vsyncadd [#allocation3], 4294959104  ;;  %v1554_v0 = vld [vmem:[#allocation2 + $0x1e0] sm:$0xff]  ;;  %v1556_v1 = vld [vmem:[#allocation2 + $0x1e8] sm:$0xff]  ;;  %vm259_vm0 = vcmask 130048   ;;  %s1255_s16 = sshll.u32 %s2337_s9, 4  ;;  %s1256_s16 = int_to_ptr.hbm [resolvable:$true] %s1255_s16 }
   0x8   :  { %2424 = vst [vmem:[#allocation11_spill] sm:$0xff] %v1556_v1  ;;  %v1558_v2 = vld [vmem:[#allocation2 + $0x1f0] sm:$0xff]  ;;  %179 = vmatpush.msra.mxu0 %v1554_v0  ;;  %199 = vmatpush.msra.mxu1 %v1556_v1  ;;  %v1562_v3 = vld [vmem:[#allocation2 + $0x1c0] sm:$0xff]  ;;  %v1564_v4 = vld [vmem:[#allocation2 + $0x1c8] sm:$0xff]  ;;  %s1498_s17 = smov [#allocation5]   ;;  %s1499_s20 = smov 128  }
   0x9   :  { %2425 = vst [vmem:[#allocation12_spill] sm:$0xff] %v1564_v4  ;;  %v1566_v5 = vld [vmem:[#allocation2 + $0x1d0] sm:$0xff]  ;;  %219 = vmatpush.msra.mxu2 %v1558_v2  ;;  %v1569_v6 = vld [vmem:[#allocation2 + $0x1a0] sm:$0xff]  ;;  %v1571_v7 = vld [vmem:[#allocation2 + $0x1a8] sm:$0xff]  ;;  %s1239_s18 = sshll.u32 %s1498_s17, 4  ;;  %s1240_s18 = int_to_ptr.vmem [resolvable:$true] %s1239_s18 }
   0xa   :  { %2426 = vst [vmem:[#allocation13_spill] sm:$0xff] %v1571_v7  ;;  %180 = vmatpush.msra.mxu0 %v1562_v3  ;;  %200 = vmatpush.msra.mxu1 %v1564_v4  ;;  %v1575_v8 = vld [vmem:[#allocation2 + $0x1b0] sm:$0xff]  ;;  %v1578_v9 = vld [vmem:[#allocation2 + $0x180] sm:$0xff]  ;;  %v1580_v10 = vld [vmem:[#allocation2 + $0x188] sm:$0xff] }
   0xb   :  { %220 = vmatpush.msra.mxu2 %v1566_v5  ;;  %2427 = vst [vmem:[#allocation14_spill] sm:$0xff] %v1580_v10  ;;  %v1584_v11 = vld [vmem:[#allocation2 + $0x190] sm:$0xff]  ;;  %v1587_v12 = vld [vmem:[#allocation2 + $0x160] sm:$0xff]  ;;  %v1589_v13 = vld [vmem:[#allocation2 + $0x168] sm:$0xff] }
   0xc   :  { %181 = vmatpush.msra.mxu0 %v1569_v6  ;;  %201 = vmatpush.msra.mxu1 %v1571_v7  ;;  %2428 = vst [vmem:[#allocation15_spill] sm:$0xff] %v1589_v13  ;;  %v1593_v14 = vld [vmem:[#allocation2 + $0x170] sm:$0xff]  ;;  %v1595_v15 = vld [vmem:[#allocation2 + $0x1f8] sm:$0xff]  ;;  %v1598_v16 = vld [vmem:[#allocation2 + $0x140] sm:$0xff] }
   0xd   :  { %221 = vmatpush.msra.mxu2 %v1575_v8  ;;  %2429 = vst [vmem:[#allocation16_spill] sm:$0xff] %v1595_v15  ;;  %v1600_v17 = vld [vmem:[#allocation2 + $0x148] sm:$0xff]  ;;  %239 = vmatpush.msra.mxu3 %v1595_v15  ;;  %v1603_v18 = vld [vmem:[#allocation2 + $0x1d8] sm:$0xff]  ;;  %v1607_v19 = vld [vmem:[#allocation2 + $0x150] sm:$0xff] }
   0xe   :  { %182 = vmatpush.msra.mxu0 %v1578_v9  ;;  %202 = vmatpush.msra.mxu1 %v1580_v10  ;;  %2430 = vst [vmem:[#allocation17_spill] sm:$0xff] %v1600_v17  ;;  %v1609_v20 = vld [vmem:[#allocation2 + $0x1b8] sm:$0xff]  ;;  %v1612_v21 = vld [vmem:[#allocation2 + $0x120] sm:$0xff]  ;;  %v1614_v22 = vld [vmem:[#allocation2 + $0x128] sm:$0xff] }
   0xf   :  { %222 = vmatpush.msra.mxu2 %v1584_v11  ;;  %2431 = vst [vmem:[#allocation18_spill] sm:$0xff] %v1603_v18  ;;  %240 = vmatpush.msra.mxu3 %v1603_v18  ;;  %v1619_v23 = vld [vmem:[#allocation2 + $0x130] sm:$0xff]  ;;  %v1621_v24 = vld [vmem:[#allocation2 + $0x198] sm:$0xff]  ;;  %v1624_v25 = vld [vmem:[#allocation2 + $0x100] sm:$0xff] }
  0x10   :  { %183 = vmatpush.msra.mxu0 %v1587_v12  ;;  %203 = vmatpush.msra.mxu1 %v1589_v13  ;;  %2432 = vst [vmem:[#allocation19_spill] sm:$0xff] %v1609_v20  ;;  %v1626_v26 = vld [vmem:[#allocation2 + $0x108] sm:$0xff]  ;;  %v1631_v27 = vld [vmem:[#allocation2 + $0x110] sm:$0xff]  ;;  %v1633_v28 = vld [vmem:[#allocation2 + $0x178] sm:$0xff] }
  0x11   :  { %223 = vmatpush.msra.mxu2 %v1593_v14  ;;  %2433 = vst [vmem:[#allocation20_spill] sm:$0xff] %v1614_v22  ;;  %241 = vmatpush.msra.mxu3 %v1609_v20  ;;  %v1636_v29 = vld [vmem:[#allocation2 + $0xe0] sm:$0xff]  ;;  %v1638_v30 = vld [vmem:[#allocation2 + $0xe8] sm:$0xff]  ;;  %v1643_v31 = vld [vmem:[#allocation2 + $0xf0] sm:$0xff] }
  0x12   :  { %184 = vmatpush.msra.mxu0 %v1598_v16  ;;  %204 = vmatpush.msra.mxu1 %v1600_v17  ;;  %2434 = vst [vmem:[#allocation21_spill] sm:$0xff] %v1621_v24  ;;  %v1645_v32 = vld [vmem:[#allocation2 + $0x158] sm:$0xff]  ;;  %v1648_v33 = vld [vmem:[#allocation2 + $0xc0] sm:$0xff]  ;;  %v1650_v34 = vld [vmem:[#allocation2 + $0xc8] sm:$0xff] }
  0x13   :  { %224 = vmatpush.msra.mxu2 %v1607_v19  ;;  %2435 = vst [vmem:[#allocation22_spill] sm:$0xff] %v1626_v26  ;;  %242 = vmatpush.msra.mxu3 %v1621_v24  ;;  %v1655_v35 = vld [vmem:[#allocation2 + $0xd0] sm:$0xff]  ;;  %v1657_v36 = vld [vmem:[#allocation2 + $0x138] sm:$0xff]  ;;  %v1660_v37 = vld [vmem:[#allocation2 + $0xa0] sm:$0xff] }
  0x14   :  { %185 = vmatpush.msra.mxu0 %v1612_v21  ;;  %205 = vmatpush.msra.mxu1 %v1614_v22  ;;  %2436 = vst [vmem:[#allocation23_spill] sm:$0xff] %v1633_v28  ;;  %v1662_v38 = vld [vmem:[#allocation2 + $0xa8] sm:$0xff]  ;;  %v1667_v39 = vld [vmem:[#allocation2 + $0xb0] sm:$0xff]  ;;  %v1669_v40 = vld [vmem:[#allocation2 + $0x118] sm:$0xff] }
  0x15   :  { %225 = vmatpush.msra.mxu2 %v1619_v23  ;;  %2437 = vst [vmem:[#allocation24_spill] sm:$0xff] %v1638_v30  ;;  %243 = vmatpush.msra.mxu3 %v1633_v28  ;;  %v1672_v41 = vld [vmem:[#allocation2 + $0x80] sm:$0xff]  ;;  %v1674_v42 = vld [vmem:[#allocation2 + $0x88] sm:$0xff]  ;;  %v1679_v43 = vld [vmem:[#allocation2 + $0x90] sm:$0xff] }
  0x16   :  { %186 = vmatpush.msra.mxu0 %v1624_v25  ;;  %206 = vmatpush.msra.mxu1 %v1626_v26  ;;  %2438 = vst [vmem:[#allocation25_spill] sm:$0xff] %v1645_v32  ;;  %v1681_v44 = vld [vmem:[#allocation2 + $0xf8] sm:$0xff]  ;;  %v1684_v45 = vld [vmem:[#allocation2 + $0x60] sm:$0xff]  ;;  %v1686_v46 = vld [vmem:[#allocation2 + $0x68] sm:$0xff] }
  0x17   :  { %226 = vmatpush.msra.mxu2 %v1631_v27  ;;  %2439 = vst [vmem:[#allocation26_spill] sm:$0xff] %v1650_v34  ;;  %244 = vmatpush.msra.mxu3 %v1645_v32  ;;  %v1691_v47 = vld [vmem:[#allocation2 + $0x70] sm:$0xff]  ;;  %v1693_v48 = vld [vmem:[#allocation2 + $0xd8] sm:$0xff]  ;;  %v1696_v49 = vld [vmem:[#allocation2 + $0x40] sm:$0xff] }
  0x18   :  { %187 = vmatpush.msra.mxu0 %v1636_v29  ;;  %207 = vmatpush.msra.mxu1 %v1638_v30  ;;  %2440 = vst [vmem:[#allocation27_spill] sm:$0xff] %v1657_v36  ;;  %v1698_v50 = vld [vmem:[#allocation2 + $0x48] sm:$0xff]  ;;  %v1703_v51 = vld [vmem:[#allocation2 + $0x50] sm:$0xff]  ;;  %v1705_v52 = vld [vmem:[#allocation2 + $0xb8] sm:$0xff] }
  0x19   :  { %227 = vmatpush.msra.mxu2 %v1643_v31  ;;  %2441 = vst [vmem:[#allocation28_spill] sm:$0xff] %v1660_v37  ;;  %245 = vmatpush.msra.mxu3 %v1657_v36  ;;  %v1708_v53 = vld [vmem:[#allocation2 + $0x20] sm:$0xff]  ;;  %v1710_v54 = vld [vmem:[#allocation2 + $0x28] sm:$0xff]  ;;  %v1715_v55 = vld [vmem:[#allocation2 + $0x30] sm:$0xff] }
  0x1a   :  { %2442 = vst [vmem:[#allocation29_spill] sm:$0xff] %v1662_v38  ;;  %188 = vmatpush.msra.mxu0 %v1648_v33  ;;  %208 = vmatpush.msra.mxu1 %v1650_v34  ;;  %v1717_v56 = vld [vmem:[#allocation2 + $0x98] sm:$0xff]  ;;  %v1720_v57 = vld [vmem:[#allocation2] sm:$0xff]  ;;  %v1722_v58 = vld [vmem:[#allocation2 + $0x8] sm:$0xff] }
  0x1b   :  { %2443 = vst [vmem:[#allocation30_spill] sm:$0xff] %v1669_v40  ;;  %228 = vmatpush.msra.mxu2 %v1655_v35  ;;  %246 = vmatpush.msra.mxu3 %v1669_v40  ;;  %v1727_v59 = vld [vmem:[#allocation2 + $0x10] sm:$0xff]  ;;  %v177_v60 = vld [vmem:[%s2329_s1] sm:$0xff]  ;;  %v1744_v62 = vld [vmem:[%s2331_s3 + $0x28] sm:$0xff] }
  0x1c   :  { %2444 = vst [vmem:[#allocation31_spill] sm:$0xff] %v1672_v41  ;;  %189 = vmatpush.msra.mxu0 %v1660_v37  ;;  %209 = vmatpush.msra.mxu1 %v1662_v38  ;;  %v1739_v61 = vld [vmem:[%s2331_s3 + $0x20] sm:$0xff]  ;;  %v1750_v63 = vld [vmem:[%s2331_s3 + $0x30] sm:$0xff]  ;;  %v1771_v40 = vld [vmem:[#allocation2 + $0x58] sm:$0xff] }
  0x1d   :  { %2445 = vst [vmem:[#allocation32_spill] sm:$0xff] %v1674_v42  ;;  %229 = vmatpush.msra.mxu2 %v1667_v39  ;;  %247 = vmatpush.msra.mxu3 %v1681_v44  ;;  %v1778_v36 = vld [vmem:[%s2331_s3 + $0x38] sm:$0xff] }
  0x1e   :  { %2446 = vst [vmem:[#allocation33_spill] sm:$0xff] %v1681_v44  ;;  %190 = vmatpush.msra.mxu0 %v1672_v41  ;;  %210 = vmatpush.msra.mxu1 %v1674_v42  ;;  %v1769_v44 = vld [vmem:[%s2331_s3 + $0x10] sm:$0xff]  ;;  %v1782_v32 = vld [vmem:[#allocation2 + $0x38] sm:$0xff] }
  0x1f   :  { %2447 = vst [vmem:[#allocation34_spill] sm:$0xff] %v1684_v45  ;;  %230 = vmatpush.msra.mxu2 %v1679_v43  ;;  %248 = vmatpush.msra.mxu3 %v1693_v48 }
  0x20   :  { %2448 = vst [vmem:[#allocation35_spill] sm:$0xff] %v1686_v46  ;;  %191 = vmatpush.msra.mxu0 %v1684_v45  ;;  %211 = vmatpush.msra.mxu1 %v1686_v46 }
  0x21   :  { %2449 = vst [vmem:[#allocation36_spill] sm:$0xff] %v1693_v48  ;;  %231 = vmatpush.msra.mxu2 %v1691_v47  ;;  %249 = vmatpush.msra.mxu3 %v1705_v52  ;;  %v1762_v48 = vld [vmem:[%s2331_s3 + $0x8] sm:$0xff] }
  0x22   :  { %2450 = vst [vmem:[#allocation37_spill] sm:$0xff] %v1696_v49  ;;  %192 = vmatpush.msra.mxu0 %v1696_v49  ;;  %212 = vmatpush.msra.mxu1 %v1698_v50 }
  0x23   :  { %2451 = vst [vmem:[#allocation38_spill] sm:$0xff] %v1698_v50  ;;  %232 = vmatpush.msra.mxu2 %v1703_v51  ;;  %250 = vmatpush.msra.mxu3 %v1717_v56 }
  0x24   :  { %2452 = vst [vmem:[#allocation39_spill] sm:$0xff] %v1705_v52  ;;  %193 = vmatpush.msra.mxu0 %v1708_v53  ;;  %213 = vmatpush.msra.mxu1 %v1710_v54  ;;  %v1757_v52 = vld [vmem:[%s2331_s3] sm:$0xff] }
  0x25   :  { %2453 = vst [vmem:[#allocation40_spill] sm:$0xff] %v1708_v53  ;;  %233 = vmatpush.msra.mxu2 %v1715_v55 }
  0x26   :  { %2454 = vst [vmem:[#allocation41_spill] sm:$0xff] %v1710_v54  ;;  %194 = vmatpush.msra.mxu0 %v1720_v57  ;;  %214 = vmatpush.msra.mxu1 %v1722_v58 }
  0x27   :  { %2455 = vst [vmem:[#allocation42_spill] sm:$0xff] %v1717_v56  ;;  %234 = vmatpush.msra.mxu2 %v1727_v59  ;;  %195 = vmatmul.f32.vlgmr.msra.gmra.mxu0 %v177_v60  ;;  %v1752_v56 = vld [vmem:[#allocation2 + $0x78] sm:$0xff] }
  0x28   :  { %2456 = vst [vmem:[#allocation43_spill] sm:$0xff] %v1720_v57  ;;  %215 = vmatmul.f32.vlgmr.msra.gmra.mxu1 %v177_v60  ;;  %235 = vmatmul.f32.vlgmr.msra.gmra.mxu2 %v177_v60 }
  0x29   :  { %2457 = vst [vmem:[#allocation44_spill] sm:$0xff] %v1722_v58  ;;  %277 = vmatpush.msrb.mxu0 %v1739_v61  ;;  %297 = vmatpush.msrb.mxu1 %v1744_v62 }
  0x2a   :  { %2458 = vst [vmem:[#allocation45_spill] sm:$0xff] %v1744_v62  ;;  %317 = vmatpush.msrb.mxu2 %v1750_v63  ;;  %251 = vmatpush.msra.mxu3 %v1752_v56 }
  0x2b   :  { %2459 = vst [vmem:[#allocation46_spill] sm:$0xff] %v1750_v63  ;;  %278 = vmatpush.msrb.mxu0 %v1757_v52  ;;  %298 = vmatpush.msrb.mxu1 %v1762_v48  ;;  %v1789_v63 = vld [vmem:[%s2328_s0] sm:$0xff] }
  0x2c   :  { %2460 = vst [vmem:[#allocation47_spill] sm:$0xff] %v1752_v56  ;;  %318 = vmatpush.msrb.mxu2 %v1769_v44  ;;  %252 = vmatpush.msra.mxu3 %v1771_v40  ;;  %v1794_v56 = vld [vmem:[#allocation2 + $0x18] sm:$0xff] }
  0x2d   :  { %2461 = vst [vmem:[#allocation48_spill] sm:$0xff] %v1762_v48  ;;  %337 = vmatpush.msra.mxu0 %v1778_v36  ;;  %390 = vmatpush.msra.mxu1 %v1554_v0 }
  0x2e   :  { %2462 = vst [vmem:[#allocation49_spill] sm:$0xff] %v1769_v44  ;;  %253 = vmatpush.msra.mxu3 %v1782_v32  ;;  %v1799_v44 = vld [vmem:[%s2331_s3 + $0x18] sm:$0xff]  ;;  %410 = vmatpush.msra.mxu2 %v1556_v1  ;;  %v1819_v1 = vld [vmem:[%s2334_s6 + $0x70] sm:$0xff] }
  0x2f   :  { %2463 = vst [vmem:[#allocation50_spill] sm:$0xff] %v1771_v40  ;;  %1270 = vmatmul.msk.f32.vlgmr.msrb.gmra.mxu0 %vm259_vm0, %v1789_v63  ;;  %391 = vmatpush.msra.mxu1 %v1562_v3 }
  0x30   :  { %2464 = vst [vmem:[#allocation51_spill] sm:$0xff] %v1778_v36  ;;  %v1807_v36 = vld [vmem:[%s2334_s6 + $0x78] sm:$0xff]  ;;  %1271 = vmatmul.msk.f32.vlgmr.msrb.gmra.mxu1 %vm259_vm0, %v1789_v63  ;;  %1272 = vmatmul.msk.f32.vlgmr.msrb.gmra.mxu2 %vm259_vm0, %v1789_v63 }
  0x31   :  { %2465 = vst [vmem:[#allocation52_spill] sm:$0xff] %v1782_v32  ;;  %254 = vmatpush.msra.mxu3 %v1794_v56  ;;  %338 = vmatpush.msra.mxu0 %v1799_v44  ;;  %v1825_v32 = vld [vmem:[%s2334_s6 + $0x68] sm:$0xff] }
  0x32   :  { %2466 = vst [vmem:[#allocation53_spill] sm:$0xff] %v1789_v63  ;;  %255 = vmatmul.f32.vlgmr.msra.gmra.mxu3 %v177_v60  ;;  %411 = vmatpush.msra.mxu2 %v1564_v4  ;;  %v1845_v60 = vld [vmem:[%s2334_s6 + $0x58] sm:$0xff]  ;;  %v1862_v4 = vld [vmem:[%s2334_s6 + $0x48] sm:$0xff] }
  0x33   :  { %2467 = vst [vmem:[#allocation54_spill] sm:$0xff] %v1794_v56  ;;  %368 = vmatpush.msrb.mxu0 %v1807_v36  ;;  %430 = vmatpush.msrb.mxu3 %v1558_v2 }
  0x34   :  { %2468 = vst [vmem:[#allocation55_spill] sm:$0xff] %v1799_v44  ;;  %392 = vmatpush.msra.mxu1 %v1569_v6  ;;  %v1834_v44 = vld [vmem:[%s2334_s6 + $0x60] sm:$0xff]  ;;  %412 = vmatpush.msra.mxu2 %v1571_v7  ;;  %v1853_v7 = vld [vmem:[%s2334_s6 + $0x50] sm:$0xff] }
  0x35   :  { %369 = vmatpush.msrb.mxu0 %v1819_v1  ;;  %431 = vmatpush.msrb.mxu3 %v1566_v5 }
  0x36   :  { %393 = vmatpush.msra.mxu1 %v1578_v9  ;;  %413 = vmatpush.msra.mxu2 %v1580_v10  ;;  %v1871_v10 = vld [vmem:[%s2334_s6 + $0x40] sm:$0xff] }
  0x37   :  { %370 = vmatpush.msrb.mxu0 %v1825_v32  ;;  %432 = vmatpush.msrb.mxu3 %v1575_v8 }
  0x38   :  { %1273 = vmatmul.msk.f32.vlgmr.msra.gmra.mxu0 %vm259_vm0, %v1789_v63  ;;  %394 = vmatpush.msra.mxu1 %v1587_v12  ;;  %v2473_v63 = vld [vmem:[#allocation36_spill] sm:$0xff] }
  0x39   :  { %371 = vmatpush.msrb.mxu0 %v1834_v44  ;;  %433 = vmatpush.msrb.mxu3 %v1584_v11 }
  0x3a   :  { %414 = vmatpush.msra.mxu2 %v1589_v13  ;;  %395 = vmatpush.msra.mxu1 %v1598_v16  ;;  %v2472_v13 = vld [vmem:[#allocation33_spill] sm:$0xff] }
  0x3b   :  { %372 = vmatpush.msrb.mxu0 %v1845_v60  ;;  %434 = vmatpush.msrb.mxu3 %v1593_v14 }
  0x3c   :  { %415 = vmatpush.msra.mxu2 %v1600_v17  ;;  %396 = vmatpush.msra.mxu1 %v1612_v21 }
  0x3d   :  { %373 = vmatpush.msrb.mxu0 %v1853_v7  ;;  %435 = vmatpush.msrb.mxu3 %v1607_v19 }
  0x3e   :  { %416 = vmatpush.msra.mxu2 %v1614_v22  ;;  %397 = vmatpush.msra.mxu1 %v1624_v25 }
  0x3f   :  { %374 = vmatpush.msrb.mxu0 %v1862_v4  ;;  %436 = vmatpush.msrb.mxu3 %v1619_v23 }
  0x40   :  { %417 = vmatpush.msra.mxu2 %v1626_v26  ;;  %398 = vmatpush.msra.mxu1 %v1636_v29  ;;  %v2471_v26 = vld [vmem:[#allocation30_spill] sm:$0xff] }
  0x41   :  { %375 = vmatpush.msrb.mxu0 %v1871_v10  ;;  %437 = vmatpush.msrb.mxu3 %v1631_v27 }
  0x42   :  { %418 = vmatpush.msra.mxu2 %v1638_v30  ;;  %399 = vmatpush.msra.mxu1 %v1648_v33  ;;  %v2470_v30 = vld [vmem:[#allocation27_spill] sm:$0xff] }
  0x43   :  { %438 = vmatpush.msrb.mxu3 %v1643_v31 }
  0x44   :  { %419 = vmatpush.msra.mxu2 %v1650_v34  ;;  %400 = vmatpush.msra.mxu1 %v1660_v37  ;;  %v2469_v34 = vld [vmem:[#allocation25_spill] sm:$0xff] }
  0x45   :  { %439 = vmatpush.msrb.mxu3 %v1655_v35 }
  0x46   :  { %420 = vmatpush.msra.mxu2 %v1662_v38  ;;  %401 = vmatpush.msra.mxu1 %v1672_v41  ;;  %v1971_v38 = vld [vmem:[%s2334_s6] sm:$0xff] }
  0x47   :  { %440 = vmatpush.msrb.mxu3 %v1667_v39 }
  0x48   :  { %421 = vmatpush.msra.mxu2 %v1674_v42  ;;  %402 = vmatpush.msra.mxu1 %v1684_v45  ;;  %v1965_v42 = vld [vmem:[%s2334_s6 + $0x8] sm:$0xff] }
  0x49   :  { %441 = vmatpush.msrb.mxu3 %v1679_v43 }
  0x4a   :  { %422 = vmatpush.msra.mxu2 %v1686_v46  ;;  %403 = vmatpush.msra.mxu1 %v1696_v49  ;;  %v1959_v46 = vld [vmem:[%s2334_s6 + $0x10] sm:$0xff] }
  0x4b   :  { %442 = vmatpush.msrb.mxu3 %v1691_v47 }
  0x4c   :  { %423 = vmatpush.msra.mxu2 %v1698_v50  ;;  %404 = vmatpush.msra.mxu1 %v1708_v53  ;;  %v1953_v50 = vld [vmem:[%s2334_s6 + $0x18] sm:$0xff] }
  0x4d   :  { %443 = vmatpush.msrb.mxu3 %v1703_v51 }
  0x4e   :  { %424 = vmatpush.msra.mxu2 %v1710_v54  ;;  %405 = vmatpush.msra.mxu1 %v1720_v57  ;;  %v1947_v54 = vld [vmem:[%s2334_s6 + $0x20] sm:$0xff] }
  0x4f   :  { %444 = vmatpush.msrb.mxu3 %v1715_v55 }
  0x50   :  { %425 = vmatpush.msra.mxu2 %v1722_v58  ;;  %487 = vmatpush.msrb.mxu1 %v1739_v61  ;;  %v1940_v58 = vld [vmem:[%s2334_s6 + $0x28] sm:$0xff] }
  0x51   :  { %445 = vmatpush.msrb.mxu3 %v1727_v59 }
  0x52   :  { %507 = vmatpush.msrb.mxu2 %v1744_v62  ;;  %488 = vmatpush.msrb.mxu1 %v1757_v52  ;;  %v1934_v62 = vld [vmem:[%s2334_s6 + $0x30] sm:$0xff] }
  0x53   :  { %601 = vmatpush.msra.mxu3 %v1554_v0 }
  0x54   :  { %508 = vmatpush.msrb.mxu2 %v1762_v48  ;;  %v1929_v48 = vld [vmem:[%s2334_s6 + $0x38] sm:$0xff] }
  0x55   :  { %602 = vmatpush.msra.mxu3 %v1562_v3  ;;  %376 = vmatpush.msrb.mxu0 %v1929_v48 }
  0x57   :  { %603 = vmatpush.msra.mxu3 %v1569_v6  ;;  %377 = vmatpush.msrb.mxu0 %v1934_v62 }
  0x59   :  { %604 = vmatpush.msra.mxu3 %v1578_v9  ;;  %378 = vmatpush.msrb.mxu0 %v1940_v58 }
  0x5b   :  { %605 = vmatpush.msra.mxu3 %v1587_v12  ;;  %379 = vmatpush.msrb.mxu0 %v1947_v54 }
  0x5d   :  { %606 = vmatpush.msra.mxu3 %v1598_v16  ;;  %380 = vmatpush.msrb.mxu0 %v1953_v50 }
  0x5f   :  { %607 = vmatpush.msra.mxu3 %v1612_v21  ;;  %381 = vmatpush.msrb.mxu0 %v1959_v46 }
  0x61   :  { %608 = vmatpush.msra.mxu3 %v1624_v25  ;;  %382 = vmatpush.msrb.mxu0 %v1965_v42 }
  0x63   :  { %609 = vmatpush.msra.mxu3 %v1636_v29  ;;  %383 = vmatpush.msrb.mxu0 %v1971_v38 }
  0x65   :  { %610 = vmatpush.msra.mxu3 %v1648_v33  ;;  %450 = vmatpush.msra.mxu0 %v1595_v15 }
  0x67   :  { %611 = vmatpush.msra.mxu3 %v1660_v37  ;;  %451 = vmatpush.msra.mxu0 %v1603_v18  ;;  %v2474_v18 = vld [vmem:[#allocation39_spill] sm:$0xff] }
  0x69   :  { %612 = vmatpush.msra.mxu3 %v1672_v41  ;;  %452 = vmatpush.msra.mxu0 %v1609_v20  ;;  %v162_v20 = vld [vmem:[%s2333_s5] sm:$0xf]  ;;  %s1241_s5 = sshll.u32 %s2336_s8, 4  ;;  %s1242_s5 = int_to_ptr.hbm [resolvable:$true] %s1241_s5 }
  0x6a   :  { %v1991_v15 = vperm.slane %v162_v20, 1  ;;  %v1998_v37 = vperm.slane %v162_v20, 2 }
  0x6b   :  { %613 = vmatpush.msra.mxu3 %v1684_v45  ;;  %453 = vmatpush.msra.mxu0 %v1621_v24  ;;  %v2479_v45 = vld [vmem:[#allocation52_spill] sm:$0xff] }
  0x6c   :  { %2477 = vst [vmem:[#allocation57_spill] sm:$0xff] %v1991_v15 }
  0x6d   :  { %614 = vmatpush.msra.mxu3 %v1696_v49  ;;  %454 = vmatpush.msra.mxu0 %v1633_v28  ;;  %v1988_v28 = vperm.slane %v162_v20, 0 }
  0x6f   :  { %615 = vmatpush.msra.mxu3 %v1708_v53  ;;  %455 = vmatpush.msra.mxu0 %v2469_v34  ;;  %2475 = vst [vmem:[#allocation56_spill] sm:$0xff] %v1988_v28  ;;  %v2476_v34 = vld [vmem:[#allocation42_spill] sm:$0xff]  ;;  %v2478_v53 = vld [vmem:[#allocation47_spill] sm:$0xff] }
  0x71   :  { %616 = vmatpush.msra.mxu3 %v1720_v57  ;;  %456 = vmatpush.msra.mxu0 %v2470_v30 }
  0x73   :  { %457 = vmatpush.msra.mxu0 %v2471_v26 }
  0x75   :  { %458 = vmatpush.msra.mxu0 %v2472_v13 }
  0x77   :  { %459 = vmatpush.msra.mxu0 %v2473_v63 }
  0x79   :  { %460 = vmatpush.msra.mxu0 %v2474_v18 }
  0x7b   :  { %461 = vmatpush.msra.mxu0 %v2476_v34 }
  0x7d   :  { %462 = vmatpush.msra.mxu0 %v2478_v53 }
  0x7f   :  { %463 = vmatpush.msra.mxu0 %v1771_v40 }
  0x81   :  { %464 = vmatpush.msra.mxu0 %v2479_v45 }
  0x83   :  { %465 = vmatpush.msra.mxu0 %v1794_v56 }
  0xa4   :  { %v196_v22 = vpop.f32.mrf.mxu0 }
  0xa5   :  { %v216_v17 = vpop.f32.mrf.mxu1 }
  0xab   :  { %v236_v24 = vpop.f32.mrf.mxu2 }
  0xac   :  { %v280_v30 = vpop.f32.mrf.mxu0 }
  0xad   :  { %v281_v26 = vadd.f32 %v280_v30, %v196_v22  ;;  %v300_v57 = vpop.f32.mrf.mxu1  ;;  %v2001_v30 = vperm.slane %v162_v20, 3 }
  0xae   :  { %v301_v13 = vadd.f32 %v300_v57, %v216_v17 }
  0xaf   :  { %v343_v63 = vadd.f32 %v281_v26, %v1988_v28 }
  0xb0   :  { %v344_v49 = vadd.f32 %v301_v13, %v1991_v15 }
  0xb1   :  { %v347_v18 = vmul.f32 0.5, %v343_v63 }
  0xb2   :  { %v348_v41 = vmul.f32 0.5, %v344_v49 }
  0xb3   :  { %1298 = vtanh.f32 %v347_v18  ;;  %v320_v34 = vpop.f32.mrf.mxu2 }
  0xb4   :  { %1300 = vtanh.f32 %v348_v41  ;;  %v321_v22 = vadd.f32 %v320_v34, %v236_v24  ;;  %v178_v24 = vld [vmem:[%s2330_s2] sm:$0xff]  ;;  %s1500_s2 = smov 8  }
  0xb5   :  { %v340_v17 = vpop.f32.mrf.mxu0  ;;  %v256_v26 = vpop.f32.mrf.mxu3 }
  0xb6   :  { %v345_v57 = vadd.f32 %v321_v22, %v1998_v37  ;;  %v341_v28 = vadd.f32 %v340_v17, %v256_v26 }
  0xb8   :  { %1302 = vtanh.f32 %v345_v57  ;;  %v346_v13 = vadd.f32 %v341_v28, %v2001_v30 }
  0xb9   :  { %v1299_v63 = vpop.eup %1298 }
  0xba   :  { %v1301_v49 = vpop.eup %1300  ;;  %v355_v15 = vmul.f32 0.5, %v1299_v63  ;;  %v350_v45 = vmul.f32 0.5, %v346_v13  ;;  %v2490_v63 = vld [vmem:[#allocation16_spill] sm:$0xff] }
  0xbb   :  { %v356_v18 = vmul.f32 0.5, %v1301_v49  ;;  %v2491_v49 = vld [vmem:[#allocation55_spill] sm:$0xff] }
  0xbc   :  { %v359_v40 = vadd.f32 0.5, %v355_v15  ;;  %1304 = vtanh.f32 %v350_v45  ;;  %v2480_v15 = vld [vmem:[#allocation46_spill] sm:$0xff]  ;;  %v2482_v45 = vld [vmem:[#allocation28_spill] sm:$0xff] }
  0xbd   :  { %v360_v20 = vadd.f32 0.5, %v356_v18  ;;  %v2492_v18 = vld [vmem:[#allocation18_spill] sm:$0xff] }
  0xbe   :  { %v1303_v34 = vpop.eup %1302 }
  0xbf   :  { %v363_v41 = vmul.f32 %v360_v20, %v178_v24  ;;  %v364_v56 = vmul.f32 %v1303_v34, %v359_v40  ;;  %v2481_v40 = vld [vmem:[#allocation49_spill] sm:$0xff]  ;;  %v2493_v24 = vld [vmem:[#allocation19_spill] sm:$0xff] }
  0xc0   :  { %v2494_v20 = vld [vmem:[#allocation21_spill] sm:$0xff]  ;;  %v2495_v34 = vld [vmem:[#allocation11_spill] sm:$0xff] }
  0xc1   :  { %v2008_v22 = vadd.f32 %v364_v56, %v363_v41  ;;  %v2489_v56 = vld [vmem:[#allocation51_spill] sm:$0xff] }
  0xc2   :  { %v1305_v17 = vpop.eup %1304  ;;  %v2496_v41 = vld [vmem:[#allocation23_spill] sm:$0xff] }
  0xc3   :  { %1306 = vtanh.f32 %v2008_v22  ;;  %v358_v28 = vmul.f32 0.5, %v1305_v17  ;;  %v2497_v17 = vld [vmem:[#allocation12_spill] sm:$0xff] }
  0xc5   :  { %v362_v26 = vadd.f32 0.5, %v358_v28  ;;  %v2498_v28 = vld [vmem:[#allocation25_spill] sm:$0xff] }
  0xc9   :  { %v1307_v57 = vpop.eup %1306 }
  0xca   :  { %v367_v13 = vmul.f32 %v1307_v57, %v362_v26  ;;  %v2499_v26 = vld [vmem:[#allocation13_spill] sm:$0xff]  ;;  %v2500_v57 = vld [vmem:[#allocation27_spill] sm:$0xff] }
  0xcc   :  { %384 = vmatmul.f32.vlgmr.msrb.gmra.mxu0 %v367_v13  ;;  %406 = vmatmul.f32.vlgmr.msra.gmra.mxu1 %v367_v13 }
  0xcd   :  { %426 = vmatmul.f32.vlgmr.msra.gmra.mxu2 %v367_v13  ;;  %446 = vmatmul.f32.vlgmr.msrb.gmra.mxu3 %v367_v13 }
  0xce   :  { %527 = vmatpush.msra.mxu1 %v2480_v15  ;;  %578 = vmatpush.msra.mxu2 %v1807_v36 }
  0xcf   :  { %641 = vmatpush.msrb.mxu0 %v1558_v2  ;;  %698 = vmatpush.msrb.mxu3 %v1739_v61 }
  0xd0   :  { %528 = vmatpush.msra.mxu1 %v2481_v40  ;;  %579 = vmatpush.msra.mxu2 %v1819_v1 }
  0xd1   :  { %642 = vmatpush.msrb.mxu0 %v1566_v5  ;;  %699 = vmatpush.msrb.mxu3 %v1757_v52 }
  0xd2   :  { %580 = vmatpush.msra.mxu2 %v1825_v32 }
  0xd3   :  { %643 = vmatpush.msrb.mxu0 %v1575_v8 }
  0xd4   :  { %466 = vmatmul.f32.vlgmr.msra.gmra.mxu0 %v367_v13  ;;  %581 = vmatpush.msra.mxu2 %v1834_v44  ;;  %v2501_v13 = vld [vmem:[#allocation14_spill] sm:$0xff] }
  0xd5   :  { %644 = vmatpush.msrb.mxu0 %v1584_v11 }
  0xd6   :  { %582 = vmatpush.msra.mxu2 %v1845_v60 }
  0xd7   :  { %645 = vmatpush.msrb.mxu0 %v1593_v14 }
  0xd8   :  { %583 = vmatpush.msra.mxu2 %v1853_v7 }
  0xd9   :  { %646 = vmatpush.msrb.mxu0 %v1607_v19 }
  0xda   :  { %584 = vmatpush.msra.mxu2 %v1862_v4 }
  0xdb   :  { %647 = vmatpush.msrb.mxu0 %v1619_v23 }
  0xdc   :  { %585 = vmatpush.msra.mxu2 %v1871_v10 }
  0xdd   :  { %648 = vmatpush.msrb.mxu0 %v1631_v27 }
  0xde   :  { %586 = vmatpush.msra.mxu2 %v1929_v48 }
  0xdf   :  { %649 = vmatpush.msrb.mxu0 %v1643_v31 }
  0xe0   :  { %587 = vmatpush.msra.mxu2 %v1934_v62 }
  0xe1   :  { %650 = vmatpush.msrb.mxu0 %v1655_v35 }
  0xe2   :  { %588 = vmatpush.msra.mxu2 %v1940_v58 }
  0xe3   :  { %651 = vmatpush.msrb.mxu0 %v1667_v39 }
  0xe4   :  { %589 = vmatpush.msra.mxu2 %v1947_v54 }
  0xe5   :  { %652 = vmatpush.msrb.mxu0 %v1679_v43 }
  0xe6   :  { %590 = vmatpush.msra.mxu2 %v1953_v50 }
  0xe7   :  { %653 = vmatpush.msrb.mxu0 %v1691_v47 }
  0xe8   :  { %591 = vmatpush.msra.mxu2 %v1959_v46 }
  0xe9   :  { %654 = vmatpush.msrb.mxu0 %v1703_v51 }
  0xea   :  { %592 = vmatpush.msra.mxu2 %v1965_v42 }
  0xeb   :  { %655 = vmatpush.msrb.mxu0 %v1715_v55 }
  0xec   :  { %593 = vmatpush.msra.mxu2 %v1971_v38 }
  0xed   :  { %656 = vmatpush.msrb.mxu0 %v1727_v59 }
  0xef   :  { %812 = vmatpush.msra.mxu0 %v1554_v0  ;;  %v2483_v0 = vld [vmem:[#allocation31_spill] sm:$0xff] }
  0xf1   :  { %813 = vmatpush.msra.mxu0 %v1562_v3  ;;  %v2484_v3 = vld [vmem:[#allocation34_spill] sm:$0xff] }
  0xf3   :  { %814 = vmatpush.msra.mxu0 %v1569_v6  ;;  %v2485_v6 = vld [vmem:[#allocation37_spill] sm:$0xff] }
  0xf5   :  { %815 = vmatpush.msra.mxu0 %v1578_v9  ;;  %v2486_v9 = vld [vmem:[#allocation40_spill] sm:$0xff] }
  0xf7   :  { %816 = vmatpush.msra.mxu0 %v1587_v12  ;;  %v2487_v12 = vld [vmem:[#allocation43_spill] sm:$0xff] }
  0xf9   :  { %817 = vmatpush.msra.mxu0 %v1598_v16  ;;  %v2066_v16 = vld [vmem:[%s2335_s7] ss:$0 sm:$0xff] }
  0xfb   :  { %818 = vmatpush.msra.mxu0 %v1612_v21 }
  0xfd   :  { %819 = vmatpush.msra.mxu0 %v1624_v25 }
  0xff   :  { %820 = vmatpush.msra.mxu0 %v1636_v29  ;;  %v2488_v29 = vld [vmem:[#allocation53_spill] sm:$0xff] }
 0x101   :  { %821 = vmatpush.msra.mxu0 %v1648_v33 }
 0x103   :  { %822 = vmatpush.msra.mxu0 %v2482_v45  ;;  %v2502_v45 = vld [vmem:[#allocation30_spill] sm:$0xff] }
 0x105   :  { %823 = vmatpush.msra.mxu0 %v2483_v0  ;;  %v2503_v0 = vld [vmem:[#allocation15_spill] sm:$0xff] }
 0x107   :  { %824 = vmatpush.msra.mxu0 %v2484_v3  ;;  %v2504_v3 = vld [vmem:[#allocation33_spill] sm:$0xff] }
 0x109   :  { %825 = vmatpush.msra.mxu0 %v2485_v6  ;;  %v2505_v6 = vld [vmem:[#allocation17_spill] sm:$0xff] }
 0x10b   :  { %826 = vmatpush.msra.mxu0 %v2486_v9  ;;  %v2506_v9 = vld [vmem:[#allocation36_spill] sm:$0xff] }
 0x10d   :  { %827 = vmatpush.msra.mxu0 %v2487_v12  ;;  %v2507_v12 = vld [vmem:[#allocation20_spill] sm:$0xff] }
 0x149   :  { %v385_v21 = vpop.f32.mrf.mxu0 }
 0x14a   :  { %v386_v25 = vadd.f32 %v2066_v16, %v385_v21  ;;  %v2508_v21 = vld [vmem:[#allocation39_spill] sm:$0xff] }
 0x14c   :  { %v2070_v33 = vadd.f32 %v386_v25, %v2488_v29  ;;  %v2509_v25 = vld [vmem:[#allocation22_spill] sm:$0xff] }
 0x14d   :  { %v2510_v29 = vld [vmem:[#allocation42_spill] sm:$0xff] }
 0x14e   :  { %389 = vst.msk [vmem:[#allocation5] sm:$0xff] %vm259_vm0, %v2070_v33  ;;  %1274 = vmatmul.msk.f32.vlgmr.msrb.gmra.mxu1 %vm259_vm0, %v2070_v33  ;;  %1275 = vmatmul.msk.f32.vlgmr.msrb.gmra.mxu2 %vm259_vm0, %v2070_v33 }
 0x14f   :  { %547 = vmatpush.msrb.mxu1 %v2489_v56  ;;  %661 = vmatpush.msrb.mxu2 %v2490_v63  ;;  %v2511_v63 = vld [vmem:[#allocation24_spill] sm:$0xff] }
 0x151   :  { %548 = vmatpush.msrb.mxu1 %v2491_v49  ;;  %662 = vmatpush.msrb.mxu2 %v2492_v18  ;;  %v2512_v18 = vld [vmem:[#allocation26_spill] sm:$0xff] }
 0x153   :  { %663 = vmatpush.msrb.mxu2 %v2493_v24  ;;  %v2523_v24 = vld [vmem:[#allocation48_spill] sm:$0xff] }
 0x155   :  { %664 = vmatpush.msrb.mxu2 %v2494_v20  ;;  %v2521_v20 = vld [vmem:[#allocation44_spill] sm:$0xff] }
 0x156   :  { %1276 = vmatmul.msk.f32.vlgmr.msra.gmra.mxu1 %vm259_vm0, %v2070_v33 }
 0x157   :  { %621 = vmatpush.msra.mxu1 %v2495_v34  ;;  %665 = vmatpush.msrb.mxu2 %v2496_v41  ;;  %v2519_v41 = vld [vmem:[#allocation38_spill] sm:$0xff] }
 0x159   :  { %622 = vmatpush.msra.mxu1 %v2497_v17  ;;  %666 = vmatpush.msrb.mxu2 %v2498_v28  ;;  %v2517_v28 = vld [vmem:[#allocation54_spill] sm:$0xff] }
 0x15b   :  { %623 = vmatpush.msra.mxu1 %v2499_v26  ;;  %667 = vmatpush.msrb.mxu2 %v2500_v57  ;;  %v2515_v57 = vld [vmem:[#allocation52_spill] sm:$0xff] }
 0x15d   :  { %624 = vmatpush.msra.mxu1 %v2501_v13  ;;  %668 = vmatpush.msrb.mxu2 %v2502_v45  ;;  %v2513_v45 = vld [vmem:[#allocation50_spill] sm:$0xff]  ;;  %v467_v13 = vpop.f32.mrf.mxu0 }
 0x15e   :  { %1277 = vmatmul.msk.f32.vlgmr.msrb.gmra.mxu1 %vm259_vm0, %v2070_v33 }
 0x15f   :  { %625 = vmatpush.msra.mxu1 %v2503_v0  ;;  %669 = vmatpush.msrb.mxu2 %v2504_v3  ;;  %v2514_v3 = vld [vmem:[#allocation29_spill] sm:$0xff] }
 0x161   :  { %626 = vmatpush.msra.mxu1 %v2505_v6  ;;  %670 = vmatpush.msrb.mxu2 %v2506_v9  ;;  %v2516_v9 = vld [vmem:[#allocation32_spill] sm:$0xff] }
 0x163   :  { %627 = vmatpush.msra.mxu1 %v2507_v12  ;;  %671 = vmatpush.msrb.mxu2 %v2508_v21  ;;  %v2518_v21 = vld [vmem:[#allocation35_spill] sm:$0xff] }
 0x165   :  { %628 = vmatpush.msra.mxu1 %v2509_v25  ;;  %672 = vmatpush.msrb.mxu2 %v2510_v29  ;;  %v2520_v29 = vld [vmem:[#allocation41_spill] sm:$0xff] }
 0x167   :  { %629 = vmatpush.msra.mxu1 %v2511_v63  ;;  %673 = vmatpush.msrb.mxu2 %v2478_v53  ;;  %v2522_v53 = vld [vmem:[#allocation45_spill] sm:$0xff]  ;;  %v2524_v63 = vld [vmem:[#allocation56_spill] sm:$0xff] }
 0x169   :  { %630 = vmatpush.msra.mxu1 %v2512_v18  ;;  %674 = vmatpush.msrb.mxu2 %v2513_v45  ;;  %v407_v45 = vpop.f32.mrf.mxu1 }
 0x16b   :  { %631 = vmatpush.msra.mxu1 %v2514_v3  ;;  %675 = vmatpush.msrb.mxu2 %v2515_v57  ;;  %v427_v3 = vpop.f32.mrf.mxu2 }
 0x16d   :  { %632 = vmatpush.msra.mxu1 %v2516_v9  ;;  %676 = vmatpush.msrb.mxu2 %v2517_v28 }
 0x16f   :  { %633 = vmatpush.msra.mxu1 %v2518_v21  ;;  %v447_v21 = vpop.f32.mrf.mxu3 }
 0x171   :  { %634 = vmatpush.msra.mxu1 %v2519_v41  ;;  %v2525_v41 = vld [vmem:[#allocation57_spill] sm:$0xff] }
 0x173   :  { %635 = vmatpush.msra.mxu1 %v2520_v29 }
 0x175   :  { %636 = vmatpush.msra.mxu1 %v2521_v20 }
 0x177   :  { %718 = vmatpush.msrb.mxu1 %v2522_v53 }
 0x179   :  { %719 = vmatpush.msrb.mxu1 %v2523_v24 }
 0x1cb   :  { %v490_v18 = vpop.f32.mrf.mxu1 }
 0x1cc   :  { %v491_v57 = vadd.f32 %v490_v18, %v407_v45 }
 0x1ce   :  { %v553_v9 = vadd.f32 %v491_v57, %v2524_v63 }
 0x1d0   :  { %v557_v25 = vmul.f32 0.5, %v553_v9 }
 0x1d1   :  { %v510_v28 = vpop.f32.mrf.mxu2 }
 0x1d2   :  { %v511_v12 = vadd.f32 %v510_v28, %v427_v3  ;;  %1308 = vtanh.f32 %v557_v25 }
 0x1d3   :  { %v530_v6 = vpop.f32.mrf.mxu1 }
 0x1d4   :  { %v554_v29 = vadd.f32 %v511_v12, %v2525_v41  ;;  %v531_v0 = vadd.f32 %v530_v6, %v447_v21  ;;  %v2543_v21 = vld [vmem:[#allocation19_spill] sm:$0xff] }
 0x1d6   :  { %v558_v20 = vmul.f32 0.5, %v554_v29  ;;  %v555_v53 = vadd.f32 %v531_v0, %v1998_v37  ;;  %v2544_v29 = vld [vmem:[#allocation21_spill] sm:$0xff] }
 0x1d8   :  { %1310 = vtanh.f32 %v558_v20  ;;  %v1309_v24 = vpop.eup %1308 }
 0x1d9   :  { %1312 = vtanh.f32 %v555_v53  ;;  %v565_v18 = vmul.f32 0.5, %v1309_v24 }
 0x1db   :  { %v550_v26 = vpop.f32.mrf.mxu1  ;;  %v569_v25 = vadd.f32 0.5, %v565_v18  ;;  %v2547_v18 = vld [vmem:[#allocation27_spill] sm:$0xff] }
 0x1dc   :  { %v551_v45 = vadd.f32 %v550_v26, %v467_v13 }
 0x1de   :  { %v1311_v57 = vpop.eup %1310  ;;  %v556_v9 = vadd.f32 %v551_v45, %v2001_v30  ;;  %v2546_v45 = vld [vmem:[#allocation25_spill] sm:$0xff] }
 0x1df   :  { %v566_v28 = vmul.f32 0.5, %v1311_v57  ;;  %v1313_v3 = vpop.eup %1312  ;;  %v2548_v57 = vld [vmem:[#allocation30_spill] sm:$0xff] }
 0x1e0   :  { %v560_v63 = vmul.f32 0.5, %v556_v9  ;;  %v574_v12 = vmul.f32 %v1313_v3, %v569_v25  ;;  %v2549_v9 = vld [vmem:[#allocation33_spill] sm:$0xff]  ;;  %v2551_v3 = vld [vmem:[#allocation39_spill] sm:$0xff]  ;;  %v2552_v25 = vld [vmem:[#allocation42_spill] sm:$0xff] }
 0x1e1   :  { %v570_v17 = vadd.f32 0.5, %v566_v28  ;;  %v2550_v28 = vld [vmem:[#allocation36_spill] sm:$0xff] }
 0x1e2   :  { %1314 = vtanh.f32 %v560_v63  ;;  %v2545_v63 = vld [vmem:[#allocation23_spill] sm:$0xff] }
 0x1e3   :  { %v573_v6 = vmul.f32 %v570_v17, %v2008_v22  ;;  %v2210_v22 = vld [vmem:[#allocation2 + $0x1f8] sm:$0xff] }
 0x1e4   :  { %v2542_v17 = vld [vmem:[#allocation48_spill] sm:$0xff] }
 0x1e5   :  { %v2123_v0 = vadd.f32 %v574_v12, %v573_v6  ;;  %v2553_v6 = vld [vmem:[#allocation47_spill] sm:$0xff]  ;;  %v2554_v12 = vld [vmem:[#allocation50_spill] sm:$0xff] }
 0x1e7   :  { %1316 = vtanh.f32 %v2123_v0 }
 0x1e8   :  { %v1315_v53 = vpop.eup %1314 }
 0x1e9   :  { %v568_v20 = vmul.f32 0.5, %v1315_v53  ;;  %v2555_v53 = vld [vmem:[#allocation52_spill] sm:$0xff] }
 0x1eb   :  { %v572_v26 = vadd.f32 0.5, %v568_v20  ;;  %v2556_v20 = vld [vmem:[#allocation54_spill] sm:$0xff] }
 0x1ed   :  { %v1317_v24 = vpop.eup %1316 }
 0x1ee   :  { %v577_v13 = vmul.f32 %v1317_v24, %v572_v26 }
 0x1f0   :  { %594 = vmatmul.f32.vlgmr.msra.gmra.mxu2 %v577_v13  ;;  %617 = vmatmul.f32.vlgmr.msra.gmra.mxu3 %v577_v13 }
 0x1f1   :  { %637 = vmatmul.f32.vlgmr.msra.gmra.mxu1 %v577_v13  ;;  %657 = vmatmul.f32.vlgmr.msrb.gmra.mxu0 %v577_v13 }
 0x1f2   :  { %738 = vmatpush.msra.mxu3 %v2480_v15  ;;  %758 = vmatpush.msra.mxu1 %v2489_v56 }
 0x1f3   :  { %852 = vmatpush.msra.mxu2 %v1558_v2  ;;  %909 = vmatpush.msrb.mxu0 %v1739_v61  ;;  %v2540_v61 = vld [vmem:[#allocation44_spill] sm:$0xff] }
 0x1f4   :  { %739 = vmatpush.msra.mxu3 %v2481_v40  ;;  %759 = vmatpush.msra.mxu1 %v2491_v49 }
 0x1f5   :  { %853 = vmatpush.msra.mxu2 %v1566_v5  ;;  %910 = vmatpush.msrb.mxu0 %v1757_v52  ;;  %v2537_v52 = vld [vmem:[#allocation35_spill] sm:$0xff] }
 0x1f7   :  { %854 = vmatpush.msra.mxu2 %v1575_v8 }
 0x1f8   :  { %677 = vmatmul.f32.vlgmr.msrb.gmra.mxu2 %v577_v13 }
 0x1f9   :  { %855 = vmatpush.msra.mxu2 %v1584_v11  ;;  %v2526_v11 = vld [vmem:[#allocation12_spill] sm:$0xff] }
 0x1fb   :  { %856 = vmatpush.msra.mxu2 %v1593_v14  ;;  %v2527_v14 = vld [vmem:[#allocation13_spill] sm:$0xff] }
 0x1fd   :  { %857 = vmatpush.msra.mxu2 %v1607_v19  ;;  %v2528_v19 = vld [vmem:[#allocation14_spill] sm:$0xff] }
 0x1ff   :  { %858 = vmatpush.msra.mxu2 %v1619_v23  ;;  %v2529_v23 = vld [vmem:[#allocation15_spill] sm:$0xff] }
 0x201   :  { %859 = vmatpush.msra.mxu2 %v1631_v27  ;;  %v2530_v27 = vld [vmem:[#allocation17_spill] sm:$0xff] }
 0x203   :  { %860 = vmatpush.msra.mxu2 %v1643_v31  ;;  %v2531_v31 = vld [vmem:[#allocation20_spill] sm:$0xff] }
 0x205   :  { %861 = vmatpush.msra.mxu2 %v1655_v35  ;;  %v2532_v35 = vld [vmem:[#allocation22_spill] sm:$0xff] }
 0x207   :  { %862 = vmatpush.msra.mxu2 %v1667_v39  ;;  %v2533_v39 = vld [vmem:[#allocation24_spill] sm:$0xff] }
 0x209   :  { %863 = vmatpush.msra.mxu2 %v1679_v43  ;;  %v2534_v43 = vld [vmem:[#allocation26_spill] sm:$0xff] }
 0x20b   :  { %864 = vmatpush.msra.mxu2 %v1691_v47  ;;  %v2535_v47 = vld [vmem:[#allocation29_spill] sm:$0xff] }
 0x20d   :  { %865 = vmatpush.msra.mxu2 %v1703_v51  ;;  %v2536_v51 = vld [vmem:[#allocation32_spill] sm:$0xff] }
 0x20f   :  { %866 = vmatpush.msra.mxu2 %v1715_v55  ;;  %v2538_v55 = vld [vmem:[#allocation38_spill] sm:$0xff] }
 0x211   :  { %867 = vmatpush.msra.mxu2 %v1727_v59  ;;  %v2539_v59 = vld [vmem:[#allocation41_spill] sm:$0xff] }
 0x213   :  { %1000 = vmatpush.msrb.mxu2 %v1807_v36 }
 0x215   :  { %1001 = vmatpush.msrb.mxu2 %v1819_v1 }
 0x217   :  { %1002 = vmatpush.msrb.mxu2 %v1825_v32 }
 0x219   :  { %1003 = vmatpush.msrb.mxu2 %v1834_v44 }
 0x21b   :  { %1004 = vmatpush.msrb.mxu2 %v1845_v60 }
 0x21d   :  { %1005 = vmatpush.msrb.mxu2 %v1853_v7 }
 0x21f   :  { %1006 = vmatpush.msrb.mxu2 %v1862_v4 }
 0x221   :  { %1007 = vmatpush.msrb.mxu2 %v1871_v10 }
 0x223   :  { %1008 = vmatpush.msrb.mxu2 %v1929_v48 }
 0x225   :  { %1009 = vmatpush.msrb.mxu2 %v1934_v62 }
 0x227   :  { %1010 = vmatpush.msrb.mxu2 %v1940_v58 }
 0x229   :  { %1011 = vmatpush.msrb.mxu2 %v1947_v54 }
 0x22b   :  { %1012 = vmatpush.msrb.mxu2 %v1953_v50 }
 0x22d   :  { %1013 = vmatpush.msrb.mxu2 %v1959_v46 }
 0x22f   :  { %1014 = vmatpush.msrb.mxu2 %v1965_v42 }
 0x231   :  { %1015 = vmatpush.msrb.mxu2 %v1971_v38 }
 0x26e   :  { %v638_v26 = vpop.f32.mrf.mxu1 }
 0x273   :  { %v595_v2 = vpop.f32.mrf.mxu2  ;;  %v618_v24 = vpop.f32.mrf.mxu3 }
 0x274   :  { %v596_v5 = vadd.f32 %v2066_v16, %v595_v2 }
 0x276   :  { %v2166_v8 = vadd.f32 %v596_v5, %v2070_v33  ;;  %v2541_v33 = vld [vmem:[#allocation45_spill] sm:$0xff] }
 0x278   :  { %600 = vst.msk [vmem:[#allocation5 + $0x8] sm:$0xff] %vm259_vm0, %v2166_v8  ;;  %1278 = vmatmul.msk.f32.vlgmr.msrb.gmra.mxu3 %vm259_vm0, %v2166_v8  ;;  %1279 = vmatmul.msk.f32.vlgmr.msrb.gmra.mxu1 %vm259_vm0, %v2166_v8 }
 0x279   :  { %789 = vmatpush.msrb.mxu3 %v1807_v36  ;;  %832 = vmatpush.msrb.mxu1 %v2495_v34  ;;  %v2214_v34 = vld [vmem:[#allocation2 + $0x1d8] sm:$0xff] }
 0x27b   :  { %790 = vmatpush.msrb.mxu3 %v1819_v1  ;;  %833 = vmatpush.msrb.mxu1 %v2526_v11 }
 0x27d   :  { %791 = vmatpush.msrb.mxu3 %v1825_v32  ;;  %834 = vmatpush.msrb.mxu1 %v2527_v14 }
 0x27f   :  { %792 = vmatpush.msrb.mxu3 %v1834_v44  ;;  %835 = vmatpush.msrb.mxu1 %v2528_v19 }
 0x280   :  { %1280 = vmatmul.msk.f32.vlgmr.msra.gmra.mxu3 %vm259_vm0, %v2166_v8  ;;  %1281 = vmatmul.msk.f32.vlgmr.msra.gmra.mxu1 %vm259_vm0, %v2166_v8 }
 0x281   :  { %793 = vmatpush.msrb.mxu3 %v1845_v60  ;;  %836 = vmatpush.msrb.mxu1 %v2529_v23 }
 0x283   :  { %794 = vmatpush.msrb.mxu3 %v1853_v7  ;;  %837 = vmatpush.msrb.mxu1 %v2530_v27  ;;  %v678_v27 = vpop.f32.mrf.mxu2 }
 0x285   :  { %795 = vmatpush.msrb.mxu3 %v1862_v4  ;;  %838 = vmatpush.msrb.mxu1 %v2531_v31  ;;  %v2557_v31 = vld [vmem:[#allocation56_spill] sm:$0xff] }
 0x287   :  { %796 = vmatpush.msrb.mxu3 %v1871_v10  ;;  %839 = vmatpush.msrb.mxu1 %v2532_v35 }
 0x289   :  { %797 = vmatpush.msrb.mxu3 %v1929_v48  ;;  %840 = vmatpush.msrb.mxu1 %v2533_v39 }
 0x28b   :  { %798 = vmatpush.msrb.mxu3 %v1934_v62  ;;  %841 = vmatpush.msrb.mxu1 %v2534_v43 }
 0x28d   :  { %799 = vmatpush.msrb.mxu3 %v1940_v58  ;;  %842 = vmatpush.msrb.mxu1 %v2535_v47  ;;  %v658_v47 = vpop.f32.mrf.mxu0 }
 0x28f   :  { %800 = vmatpush.msrb.mxu3 %v1947_v54  ;;  %843 = vmatpush.msrb.mxu1 %v2536_v51 }
 0x291   :  { %801 = vmatpush.msrb.mxu3 %v1953_v50  ;;  %844 = vmatpush.msrb.mxu1 %v2537_v52 }
 0x293   :  { %802 = vmatpush.msrb.mxu3 %v1959_v46  ;;  %845 = vmatpush.msrb.mxu1 %v2538_v55 }
 0x295   :  { %803 = vmatpush.msrb.mxu3 %v1965_v42  ;;  %846 = vmatpush.msrb.mxu1 %v2539_v59 }
 0x297   :  { %804 = vmatpush.msrb.mxu3 %v1971_v38  ;;  %847 = vmatpush.msrb.mxu1 %v2540_v61 }
 0x299   :  { %872 = vmatpush.msra.mxu3 %v2210_v22  ;;  %929 = vmatpush.msra.mxu1 %v2541_v33 }
 0x29b   :  { %873 = vmatpush.msra.mxu3 %v2214_v34  ;;  %930 = vmatpush.msra.mxu1 %v2542_v17 }
 0x29d   :  { %874 = vmatpush.msra.mxu3 %v2543_v21 }
 0x29f   :  { %875 = vmatpush.msra.mxu3 %v2544_v29 }
 0x2a1   :  { %876 = vmatpush.msra.mxu3 %v2545_v63 }
 0x2a3   :  { %877 = vmatpush.msra.mxu3 %v2546_v45 }
 0x2a5   :  { %878 = vmatpush.msra.mxu3 %v2547_v18 }
 0x2a7   :  { %879 = vmatpush.msra.mxu3 %v2548_v57 }
 0x2a9   :  { %880 = vmatpush.msra.mxu3 %v2549_v9 }
 0x2ab   :  { %881 = vmatpush.msra.mxu3 %v2550_v28 }
 0x2ad   :  { %882 = vmatpush.msra.mxu3 %v2551_v3 }
 0x2af   :  { %883 = vmatpush.msra.mxu3 %v2552_v25 }
 0x2b1   :  { %884 = vmatpush.msra.mxu3 %v2553_v6 }
 0x2b3   :  { %885 = vmatpush.msra.mxu3 %v2554_v12 }
 0x2b5   :  { %886 = vmatpush.msra.mxu3 %v2555_v53 }
 0x2b7   :  { %887 = vmatpush.msra.mxu3 %v2556_v20 }
 0x2f5   :  { %v721_v13 = vpop.f32.mrf.mxu1 }
 0x2f6   :  { %v722_v2 = vadd.f32 %v721_v13, %v638_v26 }
 0x2f8   :  { %v765_v5 = vadd.f32 %v722_v2, %v2525_v41  ;;  %v1350_v2 = vld [vmem:[#allocation2 + $0x1f0] sm:$0xff] }
 0x2fa   :  { %v769_v11 = vmul.f32 0.5, %v765_v5  ;;  %v1352_v5 = vld [vmem:[#allocation2 + $0x1b0] sm:$0xff] }
 0x2fb   :  { %v701_v14 = vpop.f32.mrf.mxu3 }
 0x2fc   :  { %v702_v19 = vadd.f32 %v701_v14, %v618_v24  ;;  %1318 = vtanh.f32 %v769_v11  ;;  %v1353_v11 = vld [vmem:[#allocation2 + $0x1b8] sm:$0xff]  ;;  %v1356_v14 = vld [vmem:[#allocation2 + $0x170] sm:$0xff] }
 0x2fd   :  { %v761_v23 = vpop.f32.mrf.mxu1 }
 0x2fe   :  { %v764_v35 = vadd.f32 %v702_v19, %v2557_v31  ;;  %v762_v39 = vadd.f32 %v761_v23, %v678_v27  ;;  %v1360_v19 = vld [vmem:[#allocation2 + $0x130] sm:$0xff]  ;;  %v1363_v27 = vld [vmem:[#allocation2 + $0x118] sm:$0xff] }
 0x2ff   :  { %v1362_v23 = vld [vmem:[#allocation2 + $0x110] sm:$0xff] }
 0x300   :  { %v768_v43 = vmul.f32 0.5, %v764_v35  ;;  %v767_v51 = vadd.f32 %v762_v39, %v2001_v30  ;;  %v1364_v35 = vld [vmem:[#allocation2 + $0xf0] sm:$0xff]  ;;  %v1365_v39 = vld [vmem:[#allocation2 + $0xf8] sm:$0xff] }
 0x302   :  { %1320 = vtanh.f32 %v768_v43  ;;  %v1319_v55 = vpop.eup %1318  ;;  %v771_v17 = vmul.f32 0.5, %v767_v51  ;;  %v1366_v43 = vld [vmem:[#allocation2 + $0xd0] sm:$0xff] }
 0x303   :  { %v741_v52 = vpop.f32.mrf.mxu3  ;;  %v777_v33 = vmul.f32 0.5, %v1319_v55  ;;  %v1368_v51 = vld [vmem:[#allocation2 + $0xb0] sm:$0xff] }
 0x304   :  { %v742_v59 = vadd.f32 %v741_v52, %v658_v47  ;;  %v1367_v47 = vld [vmem:[#allocation2 + $0xd8] sm:$0xff]  ;;  %v1370_v55 = vld [vmem:[#allocation2 + $0x90] sm:$0xff] }
 0x305   :  { %v781_v63 = vadd.f32 0.5, %v777_v33  ;;  %v1369_v52 = vld [vmem:[#allocation2 + $0xb8] sm:$0xff]  ;;  %v1373_v33 = vld [vmem:[#allocation2 + $0x50] sm:$0xff] }
 0x306   :  { %v766_v61 = vadd.f32 %v742_v59, %v1998_v37  ;;  %v1371_v59 = vld [vmem:[#allocation2 + $0x98] sm:$0xff] }
 0x307   :  { %v784_v57 = vmul.f32 %v781_v63, %v2123_v0  ;;  %v1351_v0 = vld [vmem:[#allocation2 + $0x1d0] sm:$0xff]  ;;  %v1395_v63 = vld [vmem:[#allocation2 + $0xc8] sm:$0xff] }
 0x308   :  { %v1321_v21 = vpop.eup %1320  ;;  %1322 = vtanh.f32 %v766_v61  ;;  %v1372_v61 = vld [vmem:[#allocation2 + $0x70] sm:$0xff] }
 0x309   :  { %v776_v29 = vmul.f32 0.5, %v1321_v21  ;;  %1324 = vtanh.f32 %v771_v17  ;;  %v1374_v17 = vld [vmem:[#allocation2 + $0x30] sm:$0xff] }
 0x30a   :  { %v1375_v21 = vld [vmem:[#allocation2 + $0x10] sm:$0xff] }
 0x30b   :  { %v780_v45 = vadd.f32 0.5, %v776_v29  ;;  %v1394_v29 = vld [vmem:[#allocation2 + $0xc0] sm:$0xff] }
 0x30e   :  { %v1323_v18 = vpop.eup %1322 }
 0x30f   :  { %v785_v9 = vmul.f32 %v1323_v18, %v780_v45  ;;  %v1325_v28 = vpop.eup %1324  ;;  %v1396_v45 = vld [vmem:[#allocation2 + $0xa0] sm:$0xff]  ;;  %v1397_v18 = vld [vmem:[#allocation2 + $0xa8] sm:$0xff] }
 0x310   :  { %v779_v25 = vmul.f32 0.5, %v1325_v28  ;;  %v1400_v28 = vld [vmem:[#allocation2 + $0x60] sm:$0xff] }
 0x311   :  { %v2237_v3 = vadd.f32 %v785_v9, %v784_v57  ;;  %v1398_v57 = vld [vmem:[#allocation2 + $0x80] sm:$0xff]  ;;  %v1399_v9 = vld [vmem:[#allocation2 + $0x88] sm:$0xff] }
 0x312   :  { %v783_v26 = vadd.f32 0.5, %v779_v25  ;;  %v1401_v25 = vld [vmem:[#allocation2 + $0x68] sm:$0xff] }
 0x313   :  { %1326 = vtanh.f32 %v2237_v3 }
 0x319   :  { %v1327_v24 = vpop.eup %1326 }
 0x31a   :  { %v788_v13 = vmul.f32 %v1327_v24, %v783_v26  ;;  %v1402_v26 = vld [vmem:[#allocation2 + $0x40] sm:$0xff]  ;;  %v1403_v24 = vld [vmem:[#allocation2 + $0x48] sm:$0xff] }
 0x31c   :  { %805 = vmatmul.f32.vlgmr.msrb.gmra.mxu3 %v788_v13  ;;  %828 = vmatmul.f32.vlgmr.msra.gmra.mxu0 %v788_v13 }
 0x31d   :  { %848 = vmatmul.f32.vlgmr.msrb.gmra.mxu1 %v788_v13  ;;  %868 = vmatmul.f32.vlgmr.msra.gmra.mxu2 %v788_v13 }
 0x31e   :  { %949 = vmatpush.msra.mxu0 %v2480_v15  ;;  %969 = vmatpush.msrb.mxu1 %v2489_v56  ;;  %v1354_v15 = vld [vmem:[#allocation2 + $0x190] sm:$0xff]  ;;  %v1355_v56 = vld [vmem:[#allocation2 + $0x198] sm:$0xff] }
 0x31f   :  { %1063 = vmatpush.msrb.mxu3 %v1350_v2  ;;  %1083 = vmatpush.msra.mxu2 %v2210_v22  ;;  %v1357_v22 = vld [vmem:[#allocation2 + $0x178] sm:$0xff]  ;;  %v1405_v2 = vld [vmem:[#allocation2 + $0x28] sm:$0xff] }
 0x320   :  { %950 = vmatpush.msra.mxu0 %v2481_v40  ;;  %970 = vmatpush.msrb.mxu1 %v2491_v49  ;;  %v1358_v40 = vld [vmem:[#allocation2 + $0x150] sm:$0xff]  ;;  %v1359_v49 = vld [vmem:[#allocation2 + $0x158] sm:$0xff] }
 0x321   :  { %1064 = vmatpush.msrb.mxu3 %v1351_v0  ;;  %1084 = vmatpush.msra.mxu2 %v2214_v34  ;;  %v1361_v34 = vld [vmem:[#allocation2 + $0x138] sm:$0xff]  ;;  %v1406_v0 = vld [vmem:[#allocation2] sm:$0xff] }
 0x323   :  { %1065 = vmatpush.msrb.mxu3 %v1352_v5  ;;  %1085 = vmatpush.msra.mxu2 %v1353_v11  ;;  %v1407_v5 = vld [vmem:[#allocation2 + $0x8] sm:$0xff]  ;;  %v1408_v11 = vld [vmem:[%s2331_s3 + $0x20] sm:$0xff] }
 0x324   :  { %888 = vmatmul.f32.vlgmr.msra.gmra.mxu3 %v788_v13  ;;  %v1404_v13 = vld [vmem:[#allocation2 + $0x20] sm:$0xff] }
 0x325   :  { %1066 = vmatpush.msrb.mxu3 %v1354_v15  ;;  %1086 = vmatpush.msra.mxu2 %v1355_v56  ;;  %v1409_v15 = vld [vmem:[%s2331_s3 + $0x28] sm:$0xff]  ;;  %v1410_v56 = vld [vmem:[%s2331_s3] sm:$0xff] }
 0x327   :  { %1067 = vmatpush.msrb.mxu3 %v1356_v14  ;;  %1087 = vmatpush.msra.mxu2 %v1357_v22  ;;  %v1411_v14 = vld [vmem:[%s2331_s3 + $0x8] sm:$0xff] }
 0x329   :  { %1068 = vmatpush.msrb.mxu3 %v1358_v40  ;;  %1088 = vmatpush.msra.mxu2 %v1359_v49 }
 0x32b   :  { %1069 = vmatpush.msrb.mxu3 %v1360_v19  ;;  %1089 = vmatpush.msra.mxu2 %v1361_v34 }
 0x32d   :  { %1070 = vmatpush.msrb.mxu3 %v1362_v23  ;;  %1090 = vmatpush.msra.mxu2 %v1363_v27 }
 0x32f   :  { %1071 = vmatpush.msrb.mxu3 %v1364_v35  ;;  %1091 = vmatpush.msra.mxu2 %v1365_v39 }
 0x331   :  { %1072 = vmatpush.msrb.mxu3 %v1366_v43  ;;  %1092 = vmatpush.msra.mxu2 %v1367_v47 }
 0x333   :  { %1073 = vmatpush.msrb.mxu3 %v1368_v51  ;;  %1093 = vmatpush.msra.mxu2 %v1369_v52 }
 0x335   :  { %1074 = vmatpush.msrb.mxu3 %v1370_v55  ;;  %1094 = vmatpush.msra.mxu2 %v1371_v59 }
 0x337   :  { %1075 = vmatpush.msrb.mxu3 %v1372_v61  ;;  %1095 = vmatpush.msra.mxu2 %v2553_v6  ;;  %v1390_v6 = vld [vmem:[#allocation2 + $0x100] sm:$0xff] }
 0x339   :  { %1076 = vmatpush.msrb.mxu3 %v1373_v33  ;;  %1096 = vmatpush.msra.mxu2 %v2554_v12  ;;  %v1391_v12 = vld [vmem:[#allocation2 + $0x108] sm:$0xff] }
 0x33b   :  { %1077 = vmatpush.msrb.mxu3 %v1374_v17  ;;  %1097 = vmatpush.msra.mxu2 %v2555_v53  ;;  %v1392_v53 = vld [vmem:[#allocation2 + $0xe0] sm:$0xff] }
 0x33d   :  { %1078 = vmatpush.msrb.mxu3 %v1375_v21  ;;  %1098 = vmatpush.msra.mxu2 %v2556_v20  ;;  %v1393_v20 = vld [vmem:[#allocation2 + $0xe8] sm:$0xff] }
 0x33f   :  { %1211 = vmatpush.msra.mxu3 %v1807_v36  ;;  %v1378_v36 = vld [vmem:[#allocation2 + $0x1c0] sm:$0xff] }
 0x341   :  { %1212 = vmatpush.msra.mxu3 %v1819_v1 }
 0x343   :  { %1213 = vmatpush.msra.mxu3 %v1825_v32  ;;  %v1377_v32 = vld [vmem:[#allocation2 + $0x1e8] sm:$0xff] }
 0x345   :  { %1214 = vmatpush.msra.mxu3 %v1834_v44  ;;  %v1381_v44 = vld [vmem:[#allocation2 + $0x1a8] sm:$0xff] }
 0x347   :  { %1215 = vmatpush.msra.mxu3 %v1845_v60  ;;  %v1388_v60 = vld [vmem:[#allocation2 + $0x120] sm:$0xff] }
 0x349   :  { %1216 = vmatpush.msra.mxu3 %v1853_v7 }
 0x34b   :  { %1217 = vmatpush.msra.mxu3 %v1862_v4 }
 0x34d   :  { %1218 = vmatpush.msra.mxu3 %v1871_v10  ;;  %v1376_v10 = vld [vmem:[#allocation2 + $0x1e0] sm:$0xff] }
 0x34f   :  { %1219 = vmatpush.msra.mxu3 %v1929_v48  ;;  %v1383_v48 = vld [vmem:[#allocation2 + $0x188] sm:$0xff] }
 0x351   :  { %1220 = vmatpush.msra.mxu3 %v1934_v62  ;;  %v1387_v62 = vld [vmem:[#allocation2 + $0x148] sm:$0xff] }
 0x353   :  { %1221 = vmatpush.msra.mxu3 %v1940_v58  ;;  %v1386_v58 = vld [vmem:[#allocation2 + $0x140] sm:$0xff] }
 0x355   :  { %1222 = vmatpush.msra.mxu3 %v1947_v54  ;;  %v1385_v54 = vld [vmem:[#allocation2 + $0x168] sm:$0xff] }
 0x357   :  { %1223 = vmatpush.msra.mxu3 %v1953_v50  ;;  %v1384_v50 = vld [vmem:[#allocation2 + $0x160] sm:$0xff] }
 0x359   :  { %1224 = vmatpush.msra.mxu3 %v1959_v46  ;;  %v1382_v46 = vld [vmem:[#allocation2 + $0x180] sm:$0xff] }
 0x35b   :  { %1225 = vmatpush.msra.mxu3 %v1965_v42  ;;  %v1380_v42 = vld [vmem:[#allocation2 + $0x1a0] sm:$0xff] }
 0x35d   :  { %1226 = vmatpush.msra.mxu3 %v1971_v38  ;;  %v1379_v38 = vld [vmem:[#allocation2 + $0x1c8] sm:$0xff] }
 0x399   :  { %v829_v22 = vpop.f32.mrf.mxu0 }
 0x39a   :  { %v849_v40 = vpop.f32.mrf.mxu1 }
 0x39f   :  { %v806_v1 = vpop.f32.mrf.mxu3 }
 0x3a0   :  { %v807_v4 = vadd.f32 %v2066_v16, %v806_v1  ;;  %v869_v47 = vpop.f32.mrf.mxu2 }
 0x3a2   :  { %v2268_v7 = vadd.f32 %v807_v4, %v2166_v8  ;;  %v1389_v8 = vld [vmem:[#allocation2 + $0x128] sm:$0xff] }
 0x3a4   :  { %811 = vst.msk [vmem:[#allocation5 + $0x10] sm:$0xff] %vm259_vm0, %v2268_v7  ;;  %1282 = vmatmul.msk.f32.vlgmr.msrb.gmra.mxu0 %vm259_vm0, %v2268_v7  ;;  %1283 = vmatmul.msk.f32.vlgmr.msra.gmra.mxu1 %vm259_vm0, %v2268_v7 }
 0x3a5   :  { %1023 = vmatpush.msrb.mxu0 %v1376_v10  ;;  %1043 = vmatpush.msra.mxu1 %v1377_v32 }
 0x3a7   :  { %1024 = vmatpush.msrb.mxu0 %v1378_v36  ;;  %1044 = vmatpush.msra.mxu1 %v1379_v38  ;;  %v889_v51 = vpop.f32.mrf.mxu3 }
 0x3a9   :  { %1025 = vmatpush.msrb.mxu0 %v1380_v42  ;;  %1045 = vmatpush.msra.mxu1 %v1381_v44 }
 0x3ab   :  { %1026 = vmatpush.msrb.mxu0 %v1382_v46  ;;  %1046 = vmatpush.msra.mxu1 %v1383_v48 }
 0x3ac   :  { %1284 = vmatmul.msk.f32.vlgmr.msra.gmra.mxu0 %vm259_vm0, %v2268_v7  ;;  %1285 = vmatmul.msk.f32.vlgmr.msrb.gmra.mxu1 %vm259_vm0, %v2268_v7 }
 0x3ad   :  { %1027 = vmatpush.msrb.mxu0 %v1384_v50  ;;  %1047 = vmatpush.msra.mxu1 %v1385_v54 }
 0x3af   :  { %1028 = vmatpush.msrb.mxu0 %v1386_v58  ;;  %1048 = vmatpush.msra.mxu1 %v1387_v62 }
 0x3b1   :  { %1029 = vmatpush.msrb.mxu0 %v1388_v60  ;;  %1049 = vmatpush.msra.mxu1 %v1389_v8  ;;  %v1412_v8 = vld [vmem:[%s2331_s3 + $0x30] sm:$0xff] }
 0x3b3   :  { %1030 = vmatpush.msrb.mxu0 %v1390_v6  ;;  %1050 = vmatpush.msra.mxu1 %v1391_v12  ;;  %v1414_v6 = vld [vmem:[%s2331_s3 + $0x10] sm:$0xff]  ;;  %v1415_v12 = vld [vmem:[%s2331_s3 + $0x18] sm:$0xff] }
 0x3b5   :  { %1031 = vmatpush.msrb.mxu0 %v1392_v53  ;;  %1051 = vmatpush.msra.mxu1 %v1393_v20 }
 0x3b7   :  { %1032 = vmatpush.msrb.mxu0 %v1394_v29  ;;  %1052 = vmatpush.msra.mxu1 %v1395_v63 }
 0x3b9   :  { %1033 = vmatpush.msrb.mxu0 %v1396_v45  ;;  %1053 = vmatpush.msra.mxu1 %v1397_v18 }
 0x3bb   :  { %1034 = vmatpush.msrb.mxu0 %v1398_v57  ;;  %1054 = vmatpush.msra.mxu1 %v1399_v9 }
 0x3bd   :  { %1035 = vmatpush.msrb.mxu0 %v1400_v28  ;;  %1055 = vmatpush.msra.mxu1 %v1401_v25 }
 0x3bf   :  { %1036 = vmatpush.msrb.mxu0 %v1402_v26  ;;  %1056 = vmatpush.msra.mxu1 %v1403_v24 }
 0x3c1   :  { %1037 = vmatpush.msrb.mxu0 %v1404_v13  ;;  %1057 = vmatpush.msra.mxu1 %v1405_v2 }
 0x3c3   :  { %1038 = vmatpush.msrb.mxu0 %v1406_v0  ;;  %1058 = vmatpush.msra.mxu1 %v1407_v5 }
 0x3c5   :  { %1120 = vmatpush.msra.mxu0 %v1408_v11  ;;  %1140 = vmatpush.msrb.mxu1 %v1409_v15 }
 0x3c7   :  { %1121 = vmatpush.msra.mxu0 %v1410_v56  ;;  %1141 = vmatpush.msrb.mxu1 %v1411_v14 }
 0x421   :  { %v912_v49 = vpop.f32.mrf.mxu0  ;;  %v932_v19 = vpop.f32.mrf.mxu1 }
 0x422   :  { %v913_v34 = vadd.f32 %v912_v49, %v829_v22  ;;  %v933_v23 = vadd.f32 %v932_v19, %v849_v40 }
 0x424   :  { %v975_v27 = vadd.f32 %v913_v34, %v2557_v31  ;;  %v976_v35 = vadd.f32 %v933_v23, %v2525_v41 }
 0x426   :  { %v979_v39 = vmul.f32 0.5, %v975_v27  ;;  %v980_v43 = vmul.f32 0.5, %v976_v35 }
 0x428   :  { %1328 = vtanh.f32 %v979_v39 }
 0x429   :  { %1330 = vtanh.f32 %v980_v43  ;;  %v952_v52 = vpop.f32.mrf.mxu0  ;;  %v972_v55 = vpop.f32.mrf.mxu1 }
 0x42a   :  { %v953_v59 = vadd.f32 %v952_v52, %v869_v47  ;;  %v973_v61 = vadd.f32 %v972_v55, %v889_v51 }
 0x42c   :  { %v977_v33 = vadd.f32 %v953_v59, %v1998_v37  ;;  %v978_v17 = vadd.f32 %v973_v61, %v2001_v30 }
 0x42e   :  { %v1329_v21 = vpop.eup %1328  ;;  %1332 = vtanh.f32 %v977_v33  ;;  %v982_v1 = vmul.f32 0.5, %v978_v17 }
 0x42f   :  { %v1331_v4 = vpop.eup %1330  ;;  %v987_v10 = vmul.f32 0.5, %v1329_v21 }
 0x430   :  { %v988_v32 = vmul.f32 0.5, %v1331_v4  ;;  %1334 = vtanh.f32 %v982_v1 }
 0x431   :  { %v991_v38 = vadd.f32 0.5, %v987_v10 }
 0x432   :  { %v992_v36 = vadd.f32 0.5, %v988_v32 }
 0x434   :  { %v1333_v42 = vpop.eup %1332  ;;  %v995_v44 = vmul.f32 %v992_v36, %v2237_v3  ;;  %v1413_v3 = vld [vmem:[%s2331_s3 + $0x38] sm:$0xff]  ;;  %s1497_s3 = smov [#allocation6]  }
 0x435   :  { %v996_v46 = vmul.f32 %v1333_v42, %v991_v38  ;;  %s1253_s14 = sshll.u32 %s1497_s3, 4  ;;  %s1254_s14 = int_to_ptr.vmem [resolvable:$true] %s1253_s14 }
 0x436   :  { %v1335_v48 = vpop.eup %1334 }
 0x437   :  { %v997_v50 = vadd.f32 %v996_v46, %v995_v44  ;;  %v990_v54 = vmul.f32 0.5, %v1335_v48 }
 0x439   :  { %1336 = vtanh.f32 %v997_v50  ;;  %v994_v58 = vadd.f32 0.5, %v990_v54 }
 0x43f   :  { %v1337_v62 = vpop.eup %1336 }
 0x440   :  { %v999_v60 = vmul.f32 %v1337_v62, %v994_v58 }
 0x442   :  { %1016 = vmatmul.f32.vlgmr.msrb.gmra.mxu2 %v999_v60  ;;  %1039 = vmatmul.f32.vlgmr.msrb.gmra.mxu0 %v999_v60 }
 0x443   :  { %1059 = vmatmul.f32.vlgmr.msra.gmra.mxu1 %v999_v60  ;;  %1079 = vmatmul.f32.vlgmr.msrb.gmra.mxu3 %v999_v60 }
 0x444   :  { %1160 = vmatpush.msrb.mxu0 %v1412_v8  ;;  %1180 = vmatpush.msra.mxu1 %v1413_v3 }
 0x446   :  { %1161 = vmatpush.msrb.mxu0 %v1414_v6  ;;  %1181 = vmatpush.msra.mxu1 %v1415_v12 }
 0x44a   :  { %1099 = vmatmul.f32.vlgmr.msra.gmra.mxu2 %v999_v60 }
 0x4bf   :  { %v1040_v63 = vpop.f32.mrf.mxu0 }
 0x4c0   :  { %v1060_v45 = vpop.f32.mrf.mxu1 }
 0x4c5   :  { %v1017_v53 = vpop.f32.mrf.mxu2 }
 0x4c6   :  { %v1018_v20 = vadd.f32 %v2066_v16, %v1017_v53  ;;  %v1080_v13 = vpop.f32.mrf.mxu3 }
 0x4c8   :  { %v1020_v29 = vadd.f32 %v1018_v20, %v2268_v7 }
 0x4ca   :  { %1022 = vst.msk [vmem:[#allocation5 + $0x18] sm:$0xff] %vm259_vm0, %v1020_v29  ;;  %1286 = vmatmul.msk.f32.vlgmr.msra.gmra.mxu0 %vm259_vm0, %v1020_v29  ;;  %1287 = vmatmul.msk.f32.vlgmr.msrb.gmra.mxu1 %vm259_vm0, %v1020_v29 }
 0x4cd   :  { %v1100_v2 = vpop.f32.mrf.mxu2 }
 0x4d2   :  { %1288 = vmatmul.msk.f32.vlgmr.msrb.gmra.mxu0 %vm259_vm0, %v1020_v29  ;;  %1289 = vmatmul.msk.f32.vlgmr.msra.gmra.mxu1 %vm259_vm0, %v1020_v29 }
 0x547   :  { %v1123_v18 = vpop.f32.mrf.mxu0  ;;  %v1143_v57 = vpop.f32.mrf.mxu1 }
 0x548   :  { %v1124_v9 = vadd.f32 %v1123_v18, %v1040_v63  ;;  %v1144_v28 = vadd.f32 %v1143_v57, %v1060_v45 }
 0x54a   :  { %v1186_v25 = vadd.f32 %v1124_v9, %v2557_v31  ;;  %v1187_v7 = vadd.f32 %v1144_v28, %v2525_v41 }
 0x54c   :  { %v1190_v26 = vmul.f32 0.5, %v1186_v25  ;;  %v1191_v24 = vmul.f32 0.5, %v1187_v7 }
 0x54e   :  { %1338 = vtanh.f32 %v1190_v26 }
 0x54f   :  { %1340 = vtanh.f32 %v1191_v24  ;;  %v1163_v0 = vpop.f32.mrf.mxu0  ;;  %v1183_v5 = vpop.f32.mrf.mxu1 }
 0x550   :  { %v1164_v11 = vadd.f32 %v1163_v0, %v1080_v13  ;;  %v1184_v15 = vadd.f32 %v1183_v5, %v1100_v2 }
 0x552   :  { %v1188_v56 = vadd.f32 %v1164_v11, %v1998_v37  ;;  %v1189_v14 = vadd.f32 %v1184_v15, %v2001_v30 }
 0x554   :  { %v1339_v22 = vpop.eup %1338  ;;  %1342 = vtanh.f32 %v1188_v56  ;;  %v1193_v40 = vmul.f32 0.5, %v1189_v14 }
 0x555   :  { %v1341_v31 = vpop.eup %1340  ;;  %v1198_v49 = vmul.f32 0.5, %v1339_v22 }
 0x556   :  { %v1199_v41 = vmul.f32 0.5, %v1341_v31  ;;  %1344 = vtanh.f32 %v1193_v40 }
 0x557   :  { %v1202_v34 = vadd.f32 0.5, %v1198_v49 }
 0x558   :  { %v1203_v19 = vadd.f32 0.5, %v1199_v41 }
 0x55a   :  { %v1343_v23 = vpop.eup %1342  ;;  %v1206_v27 = vmul.f32 %v1203_v19, %v997_v50 }
 0x55b   :  { %v1207_v35 = vmul.f32 %v1343_v23, %v1202_v34 }
 0x55c   :  { %v1345_v39 = vpop.eup %1344 }
 0x55d   :  { %v1208_v43 = vadd.f32 %v1207_v35, %v1206_v27  ;;  %v1201_v47 = vmul.f32 0.5, %v1345_v39 }
 0x55f   :  { %1346 = vtanh.f32 %v1208_v43  ;;  %v1205_v51 = vadd.f32 0.5, %v1201_v47 }
 0x565   :  { %v1347_v37 = vpop.eup %1346 }
 0x566   :  { %v1210_v52 = vmul.f32 %v1347_v37, %v1205_v51 }
 0x568   :  { %1227 = vmatmul.f32.vlgmr.msra.gmra.mxu3 %v1210_v52  ;;  %1234 = vst [vmem:[#allocation6] sm:$0xff] %v1210_v52 }
 0x569   :  { %1258 = dma.vmem_to_hbm [thread:$0]  %s1254_s14, 128, %s1256_s16, [#allocation7]  }
 0x5eb   :  { %v1228_v30 = vpop.f32.mrf.mxu3 }
 0x5ec   :  { %v1229_v55 = vadd.f32 %v2066_v16, %v1228_v30 }
 0x5ee   :  { %v1231_v59 = vadd.f32 %v1229_v55, %v1020_v29 }
 0x5f0   :  { %1233 = vst.msk [vmem:[#allocation5 + $0x20] sm:$0xff] %vm259_vm0, %v1231_v59 }
 0x5f1   :  { %1247 = dma.vmem_to_hbm [thread:$0]  %s1240_s18, 640, %s1242_s5, [#allocation4], %s1499_s20, %s1499_s20, %s1500_s2  }
 0x5f2   :  { %1490 = dma.done.wait [#allocation4], 640  }
 0x5f3   :  { %1491 = vsyncadd [#allocation4], 4294966656 }
 0x5f4   :  { %1492 = dma.done.wait [#allocation7], 128  }
 0x5f5   :  { %1493 = vsyncadd [#allocation7], 4294967168 }
 0x5f6   :  { %1267 = vsyncpa [#allocation3], 1 }
 0x5f7   :  { %1268 = vsyncpa [#allocation4], 1 }
 0x5f8   :  { %1269 = vsyncpa [#allocation7], 1 }

</bundles_post_ra>
